<compile_context>
chip_gen: v7x
topology: tpu7x:2x2x1
jax: 0.10.0
libtpu: 0.0.40
codegen_flags: <defaults>
</compile_context>

<pallas_src>
import functools

import numpy as np

import jax
import jax.numpy as jnp
from jax.experimental import pallas as pl
from jax.experimental.pallas import tpu as pltpu


# ------------------------------ fused Pallas kernel ------------------------------- #

def _psp_fused_kernel(x_ref, pt_ref, ut_ref, mcat_ref, mask_ref, wf_ref,
                      bias_ref, o_ref, v_ref, *, n_stages, tm, n_px):
    """Fused PSP forward.

    x_ref    : (Cin, HW_pad)        f32/bf16  feats slab (resident per batch element)
    pt_ref   : (HW_pad, S_pad)      f32       adaptive-avg-pool weights (all stages)
    ut_ref   : (S_pad, TM)          bf16      bilinear upsample weights, this pixel tile
    mcat_ref : (Cout, n_stages*Cin) f32       folded stage matrices [M_1 | ... | M_n]
    mask_ref : (ns_pad, S_pad)      f32       0/1 bin-membership mask per stage
    wf_ref   : (Cout, Cin)          bf16      bn_scale-folded bottleneck block on feats
    bias_ref : (Cout, 1)            f32       folded bias (bn + upsampled stage biases)
    o_ref    : (Cout, TM)           out       lane-dense output tile
    v_ref    : (Cout, S_pad)        bf16      scratch: per-batch folded prior values V
    """
    j = pl.program_id(1)

    @pl.when(j == 0)
    def _():
        # All pyramid pools in one MXU pass over the resident slab (f32, exact weights).
        pooled = jnp.dot(x_ref[...], pt_ref[...],
                         preferred_element_type=jnp.float32)        # (Cin, S_pad)
        # Per-bin stage transform as a single matmul: stack masked copies of pooled
        # along channels and hit them with the concatenated folded stage matrices.
        stacked = jnp.concatenate(
            [pooled * mask_ref[k:k + 1, :] for k in range(n_stages)], axis=0)
        v_ref[...] = jnp.dot(mcat_ref[...], stacked,
                             preferred_element_type=jnp.float32).astype(v_ref.dtype)

    # Bottleneck for this pixel tile: folded feats conv + folded, upsampled stage priors.
    if n_px == 1:
        x_tile = x_ref[...]
    else:
        start = pl.multiple_of(j * tm, 128)
        x_tile = x_ref[:, pl.ds(start, tm)]
    acc = jnp.dot(wf_ref[...], x_tile.astype(jnp.bfloat16),
                  preferred_element_type=jnp.float32)
    acc = acc + jnp.dot(v_ref[...], ut_ref[...],
                        preferred_element_type=jnp.float32)
    o_ref[...] = jnp.maximum(acc + bias_ref[...], 0.0).astype(o_ref.dtype)


# --------------------------- static (trace-time) matrices -------------------------- #

def _round_up(x, m):
    return (x + m - 1) // m * m


def _adaptive_pool_matrix(out_size, in_size):
    """PyTorch AdaptiveAvgPool1d averaging matrix, shape (out_size, in_size)."""
    a = np.zeros((out_size, in_size), np.float32)
    for i in range(out_size):
        start = (i * in_size) // out_size
        end = ((i + 1) * in_size + out_size - 1) // out_size
        a[i, start:end] = 1.0 / float(end - start)
    return a


def _upsample_matrix(out_size, in_size):
    """Bilinear (align_corners=False, as in the module) 1-D interpolation matrix."""
    r = np.zeros((out_size, in_size), np.float32)
    for o in range(out_size):
        src = (o + 0.5) * in_size / out_size - 0.5
        lo = int(np.floor(src))
        frac = src - lo
        lo_c = min(max(lo, 0), in_size - 1)
        hi_c = min(max(lo + 1, 0), in_size - 1)
        r[o, lo_c] += 1.0 - frac
        r[o, hi_c] += frac
    return r


def _build_psp_matrices(H, W, sizes):
    """P (S, H*W): 2-D pooling weights; UT (S, H*W): 2-D bilinear upsample weights."""
    p_blocks, u_blocks = [], []
    for s in sizes:
        ah = _adaptive_pool_matrix(s, H)
        aw = _adaptive_pool_matrix(s, W)
        p = np.einsum("iy,jx->ijyx", ah, aw).reshape(s * s, H * W)
        rh = _upsample_matrix(H, s)
        rw = _upsample_matrix(W, s)
        u = np.einsum("yi,xj->ijyx", rh, rw).reshape(s * s, H * W)
        p_blocks.append(p)
        u_blocks.append(u)
    return np.concatenate(p_blocks, 0), np.concatenate(u_blocks, 0)


# ------------------------------------- forward ------------------------------------- #

def psp_module_forward(feats_nchw, params, sizes, out_dtype=jnp.float32):
    N, Cin, H, W = feats_nchw.shape
    Cout = params["bn_scale"].shape[0]
    n_stages = len(sizes)
    HW = H * W
    S = sum(s * s for s in sizes)
    S_pad = _round_up(S, 128)                 # lane-dense pooled / V / P^T
    ns_pad = _round_up(n_stages, 8)

    # ---- pixel tile: full (padded) HW when small, else 128-multiple w/ min padding ----
    MAX_TM = 2048
    HW_128 = _round_up(HW, 128)
    if HW_128 <= MAX_TM:
        TM = HW_128
    else:
        TM, best_pad = 128, None
        for t in range(MAX_TM, 0, -128):
            pad = _round_up(HW, t) - HW
            if best_pad is None or pad < best_pad:
                TM, best_pad = t, pad
    n_px = (HW + TM - 1) // TM
    HW_pad = n_px * TM

    # ---- static pooling / bilinear matrices and stage bin masks (trace-time consts) ---
    p_np, ut_np = _build_psp_matrices(H, W, sizes)
    pt_pad = np.zeros((HW_pad, S_pad), np.float32)
    pt_pad[:HW, :S] = p_np.T
    ut_pad = np.zeros((S_pad, HW_pad), np.float32)
    ut_pad[:S, :HW] = ut_np
    mask_np = np.zeros((ns_pad, S_pad), np.float32)
    off = 0
    for k, s in enumerate(sizes):
        mask_np[k, off:off + s * s] = 1.0
        off += s * s
    pt = jnp.asarray(pt_pad, dtype=feats_nchw.dtype)   # exact pooling weights (f32 here)
    ut = jnp.asarray(ut_pad, jnp.bfloat16)             # streamed per pixel tile
    mask = jnp.asarray(mask_np)                        # f32 0/1

    # ---- fold weights (data-independent; constant-folded by XLA under jit) ------------
    bn_scale = params["bn_scale"].astype(jnp.float32)
    bn_bias = params["bn_bias"].astype(jnp.float32)
    m_parts = []
    c_fold = jnp.zeros((Cout,), jnp.float32)
    for k in range(n_stages):
        m_s = params["bneck_w_stages"][k] @ (
            params["stage_scale"][k][:, None] * params["stage_w"][k])
        m_parts.append(bn_scale[:, None] * m_s)                        # (Cout, Cin)
        c_fold = c_fold + params["bneck_w_stages"][k] @ params["stage_bias"][k]
    m_cat = jnp.concatenate(m_parts, axis=1)                           # (Cout, ns*Cin) f32
    wf = (bn_scale[:, None] * params["bneck_w_feats"]).astype(jnp.bfloat16)
    bias2d = (bn_bias + bn_scale * c_fold).reshape(Cout, 1)

    # ---- feats: NCHW -> (N, Cin, HW_pad); free reshape, pad only if actually needed ---
    x2d = feats_nchw.reshape(N, Cin, HW)
    if HW_pad != HW:
        x2d = jnp.pad(x2d, ((0, 0), (0, 0), (0, HW_pad - HW)))

    # ---- VMEM budgeting (v7x: 64 MiB physical, 32 MiB scoped default) -----------------
    x_block_bytes = Cin * HW_pad * x2d.dtype.itemsize
    x_big = x_block_bytes > (8 << 20)
    if x_big:
        # Production-size slab: single-buffer it; the kernel is HBM-bound there anyway.
        x_spec = pl.BlockSpec((None, Cin, HW_pad), lambda n, j: (n, 0, 0),
                              pipeline_mode=pl.Buffered(1))
        n_xbuf = 1
    else:
        x_spec = pl.BlockSpec((None, Cin, HW_pad), lambda n, j: (n, 0, 0))
        n_xbuf = 2

    out_isize = jnp.dtype(out_dtype).itemsize
    est_bytes = (n_xbuf * x_block_bytes
                 + 2 * pt.size * pt.dtype.itemsize
                 + 2 * S_pad * TM * 2
                 + m_cat.size * 4 + mask.size * 4 + wf.size * 2 + Cout * 4
                 + 2 * Cout * TM * out_isize
                 + Cout * S_pad * 2)
    vmem_limit = int(min(max(int(est_bytes * 1.5) + (8 << 20), 32 << 20), 100 << 20))

    flops = 2 * N * (Cin * HW_pad * S_pad
                     + Cout * n_stages * Cin * S_pad
                     + Cout * HW_pad * (Cin + S_pad))
    bytes_accessed = (N * Cin * HW_pad * x2d.dtype.itemsize
                      + pt.size * pt.dtype.itemsize
                      + N * ut.size * 2
                      + N * Cout * HW_pad * out_isize)

    kernel = functools.partial(_psp_fused_kernel,
                               n_stages=n_stages, tm=TM, n_px=n_px)

    out2d = pl.pallas_call(
        kernel,
        out_shape=jax.ShapeDtypeStruct((N, Cout, HW_pad), out_dtype),
        grid=(N, n_px),
        in_specs=[
            x_spec,                                                     # feats slab (resident)
            pl.BlockSpec((HW_pad, S_pad), lambda n, j: (0, 0)),         # P^T  pooling weights
            pl.BlockSpec((S_pad, TM), lambda n, j: (0, j)),             # U^T  upsample tile
            pl.BlockSpec((Cout, n_stages * Cin), lambda n, j: (0, 0)),  # folded stage mats
            pl.BlockSpec((ns_pad, S_pad), lambda n, j: (0, 0)),         # stage bin masks
            pl.BlockSpec((Cout, Cin), lambda n, j: (0, 0)),             # folded W_feats
            pl.BlockSpec((Cout, 1), lambda n, j: (0, 0)),               # folded bias
        ],
        out_specs=pl.BlockSpec((None, Cout, TM), lambda n, j: (n, 0, j)),
        scratch_shapes=[pltpu.VMEM((Cout, S_pad), jnp.bfloat16)],       # per-batch V
        compiler_params=pltpu.CompilerParams(
            dimension_semantics=("parallel", "arbitrary"),
            vmem_limit_bytes=vmem_limit),
        cost_estimate=pl.CostEstimate(flops=int(flops), transcendentals=0,
                                      bytes_accessed=int(bytes_accessed)),
    )(x2d, pt, ut, m_cat, mask, wf, bias2d)

    # Dropout2d(0.1): inference-mode identity.
    if HW_pad != HW:
        out2d = out2d[:, :, :HW]
    return out2d.reshape(N, Cout, H, W)


# -------------------------- plain-JAX reference (validation) ------------------------ #

def psp_reference(feats, params, sizes):
    N, Cin, H, W = feats.shape
    priors = []
    for k, s in enumerate(sizes):
        ah = jnp.asarray(_adaptive_pool_matrix(s, H))
        aw = jnp.asarray(_adaptive_pool_matrix(s, W))
        pooled = jnp.einsum("iy,ncyx,jx->ncij", ah, feats, aw)
        y = jnp.einsum("oc,ncij->noij", params["stage_w"][k], pooled)
        y = (y * params["stage_scale"][k][None, :, None, None]
             + params["stage_bias"][k][None, :, None, None])
        rh = jnp.asarray(_upsample_matrix(H, s))
        rw = jnp.asarray(_upsample_matrix(W, s))
        priors.append(jnp.einsum("yi,noij,xj->noyx", rh, y, rw))
    priors.append(feats)
    cat = jnp.concatenate(priors, axis=1)
    wb = jnp.concatenate(params["bneck_w_stages"] + [params["bneck_w_feats"]], axis=1)
    conv = jnp.einsum("ok,nkyx->noyx", wb, cat)
    out = (conv * params["bn_scale"][None, :, None, None]
           + params["bn_bias"][None, :, None, None])
    return jnp.maximum(out, 0.0)


# -------------------------------- parameter setup ----------------------------------- #

def _fold_bn(key, c):
    kg, kb, km, kv = jax.random.split(key, 4)
    gamma = 1.0 + 0.1 * jax.random.normal(kg, (c,), jnp.float32)
    beta = 0.1 * jax.random.normal(kb, (c,), jnp.float32)
    mean = 0.1 * jax.random.normal(km, (c,), jnp.float32)
    var = 1.0 + 0.1 * jnp.abs(jax.random.normal(kv, (c,), jnp.float32))
    scale = gamma / jnp.sqrt(var + 1e-5)
    bias = beta - mean * scale
    return scale, bias


def init_psp_params(key, in_chans, out_chans, sizes):
    n = len(sizes)
    keys = jax.random.split(key, 2 * n + 2)
    params = {"stage_w": [], "stage_scale": [], "stage_bias": [],
              "bneck_w_stages": []}
    for k in range(n):
        w = jax.random.normal(keys[2 * k], (out_chans, in_chans),
                              jnp.float32) / np.sqrt(in_chans)
        sc, bi = _fold_bn(keys[2 * k + 1], out_chans)
        params["stage_w"].append(w)
        params["stage_scale"].append(sc)
        params["stage_bias"].append(bi)
    k_total = in_chans + n * out_chans
    wb = jax.random.normal(keys[-2], (out_chans, k_total),
                           jnp.float32) / np.sqrt(k_total)
    off = 0
    for _ in range(n):                               # concat order: stages..., feats
        params["bneck_w_stages"].append(wb[:, off:off + out_chans])
        off += out_chans
    params["bneck_w_feats"] = wb[:, off:]
    sc, bi = _fold_bn(keys[-1], out_chans)
    params["bn_scale"] = sc
    params["bn_bias"] = bi
    return params


# --------------------------------------- main --------------------------------------- #

if __name__ == "__main__":
    key = jax.random.PRNGKey(0)
    N, Cin, H, W = 2, 32, 32, 32
    Cout = 16
    sizes = (1, 2, 3, 6)

    kx, kp = jax.random.split(key)
    feats = jax.random.normal(kx, (N, Cin, H, W), jnp.float32)   # NCHW (PyTorch layout)
    params = init_psp_params(kp, Cin, Cout, sizes)

    run = jax.jit(lambda x: psp_module_forward(x, params, sizes))
    out = run(feats)
    jax.block_until_ready(out)

    assert out.shape == (N, Cout, H, W), out.shape
    assert bool(jnp.all(jnp.isfinite(out)))

    # Validate the fused/folded Pallas path against a direct f32 implementation of the
    # module dataflow (loose tolerance: bf16 streaming inside the bottleneck dots).
    ref = psp_reference(feats, params, sizes)
    assert bool(jnp.allclose(out, ref, rtol=5e-2, atol=5e-2)), \
        float(jnp.max(jnp.abs(out - ref)))

    print("KERNEL_OK")
</pallas_src>

<mosaic_0001>
module attributes {stable_mosaic.version = 11 : i64} {
  func.func @_psp_fused_kernel(%arg0: i32, %arg1: i32, %arg2: memref<1x32x1024xf32, #tpu.memory_space<vmem>>, %arg3: memref<1024x128xf32, #tpu.memory_space<vmem>>, %arg4: memref<128x1024xbf16, #tpu.memory_space<vmem>>, %arg5: memref<16x128xf32, #tpu.memory_space<vmem>>, %arg6: memref<8x128xf32, #tpu.memory_space<vmem>>, %arg7: memref<16x32xbf16, #tpu.memory_space<vmem>>, %arg8: memref<16x1xf32, #tpu.memory_space<vmem>>, %arg9: memref<1x16x1024xf32, #tpu.memory_space<vmem>>, %arg10: memref<16x128xbf16, #tpu.memory_space<vmem>>) attributes {dimension_semantics = [#tpu.dimension_semantics<parallel>, #tpu.dimension_semantics<arbitrary>], iteration_bounds = array<i64: 2, 1>, scalar_prefetch = 0 : i64, scratch_operands = 1 : i64, tpu.core_type = #tpu.core_type<tc>, window_params = [{transform_indices = @transform_0, window_bounds = array<i64: 1, 32, 1024>}, {pipeline_mode = #tpu.pipeline_mode<synchronous>, transform_indices = @transform_1, window_bounds = array<i64: 1024, 128>}, {transform_indices = @transform_2, window_bounds = array<i64: 128, 1024>}, {pipeline_mode = #tpu.pipeline_mode<synchronous>, transform_indices = @transform_3, window_bounds = array<i64: 16, 128>}, {pipeline_mode = #tpu.pipeline_mode<synchronous>, transform_indices = @transform_4, window_bounds = array<i64: 8, 128>}, {pipeline_mode = #tpu.pipeline_mode<synchronous>, transform_indices = @transform_5, window_bounds = array<i64: 16, 32>}, {pipeline_mode = #tpu.pipeline_mode<synchronous>, transform_indices = @transform_6, window_bounds = array<i64: 16, 1>}, {transform_indices = @transform_7, window_bounds = array<i64: 1, 16, 1024>}]} {
    %c0_i32 = arith.constant 0 : i32
    %0 = arith.cmpi eq, %arg1, %c0_i32 : i32
    %1 = arith.extui %0 : i1 to i32
    %c0_i32_0 = arith.constant 0 : i32
    %2 = arith.cmpi ne, %1, %c0_i32_0 : i32
    scf.if %2 {
      %c0_16 = arith.constant 0 : index
      %c0_17 = arith.constant 0 : index
      %c0_18 = arith.constant 0 : index
      %20 = vector.load %arg2[%c0_16, %c0_17, %c0_18] : memref<1x32x1024xf32, #tpu.memory_space<vmem>>, vector<1x32x1024xf32>
      %21 = vector.shape_cast %20 : vector<1x32x1024xf32> to vector<32x1024xf32>
      %c0_19 = arith.constant 0 : index
      %c0_20 = arith.constant 0 : index
      %22 = vector.load %arg3[%c0_19, %c0_20] : memref<1024x128xf32, #tpu.memory_space<vmem>>, vector<1024x128xf32>
      %cst_21 = arith.constant dense<0.000000e+00> : vector<32x128xf32>
      %23 = tpu.matmul %21, %22, %cst_21 {dimension_numbers = #tpu.dot_dimension_numbers<[1], [0], [0], [1], [0, 0, 1, 1], [], []>} : vector<32x1024xf32>, vector<1024x128xf32>, vector<32x128xf32> -> vector<32x128xf32>
      %c0_22 = arith.constant 0 : index
      %c0_23 = arith.constant 0 : index
      %24 = vector.load %arg6[%c0_22, %c0_23] : memref<8x128xf32, #tpu.memory_space<vmem>>, vector<1x128xf32>
      %25 = vector.broadcast %24 : vector<1x128xf32> to vector<32x128xf32>
      %26 = arith.mulf %23, %25 : vector<32x128xf32>
      %c1 = arith.constant 1 : index
      %c0_24 = arith.constant 0 : index
      %27 = vector.load %arg6[%c1, %c0_24] : memref<8x128xf32, #tpu.memory_space<vmem>>, vector<1x128xf32>
      %28 = vector.broadcast %27 : vector<1x128xf32> to vector<32x128xf32>
      %29 = arith.mulf %23, %28 : vector<32x128xf32>
      %c2 = arith.constant 2 : index
      %c0_25 = arith.constant 0 : index
      %30 = vector.load %arg6[%c2, %c0_25] : memref<8x128xf32, #tpu.memory_space<vmem>>, vector<1x128xf32>
      %31 = vector.broadcast %30 : vector<1x128xf32> to vector<32x128xf32>
      %32 = arith.mulf %23, %31 : vector<32x128xf32>
      %c3 = arith.constant 3 : index
      %c0_26 = arith.constant 0 : index
      %33 = vector.load %arg6[%c3, %c0_26] : memref<8x128xf32, #tpu.memory_space<vmem>>, vector<1x128xf32>
      %34 = vector.broadcast %33 : vector<1x128xf32> to vector<32x128xf32>
      %35 = arith.mulf %23, %34 : vector<32x128xf32>
      %36 = tpu.concatenate %26, %29, %32, %35 in 0 : vector<32x128xf32>, vector<32x128xf32>, vector<32x128xf32>, vector<32x128xf32> -> vector<128x128xf32>
      %c0_27 = arith.constant 0 : index
      %c0_28 = arith.constant 0 : index
      %37 = vector.load %arg5[%c0_27, %c0_28] : memref<16x128xf32, #tpu.memory_space<vmem>>, vector<16x128xf32>
      %cst_29 = arith.constant dense<0.000000e+00> : vector<16x128xf32>
      %38 = tpu.matmul %37, %36, %cst_29 {dimension_numbers = #tpu.dot_dimension_numbers<[1], [0], [0], [1], [0, 0, 1, 1], [], []>} : vector<16x128xf32>, vector<128x128xf32>, vector<16x128xf32> -> vector<16x128xf32>
      %39 = arith.truncf %38 : vector<16x128xf32> to vector<16x128xbf16>
      %c0_30 = arith.constant 0 : index
      %c0_31 = arith.constant 0 : index
      %40 = vector.load %arg10[%c0_30, %c0_31] : memref<16x128xbf16, #tpu.memory_space<vmem>>, vector<16x128xbf16>
      tpu.vector_store %arg10[%c0_30, %c0_31], %39 {strides = array<i32>} : memref<16x128xbf16, #tpu.memory_space<vmem>>, vector<16x128xbf16>,
    } else {
    }
    %c0 = arith.constant 0 : index
    %c0_1 = arith.constant 0 : index
    %c0_2 = arith.constant 0 : index
    %3 = vector.load %arg2[%c0, %c0_1, %c0_2] : memref<1x32x1024xf32, #tpu.memory_space<vmem>>, vector<1x32x1024xf32>
    %4 = vector.shape_cast %3 : vector<1x32x1024xf32> to vector<32x1024xf32>
    %c0_3 = arith.constant 0 : index
    %c0_4 = arith.constant 0 : index
    %5 = vector.load %arg7[%c0_3, %c0_4] : memref<16x32xbf16, #tpu.memory_space<vmem>>, vector<16x32xbf16>
    %6 = arith.truncf %4 : vector<32x1024xf32> to vector<32x1024xbf16>
    %cst = arith.constant dense<0.000000e+00> : vector<16x1024xf32>
    %7 = tpu.matmul %5, %6, %cst {dimension_numbers = #tpu.dot_dimension_numbers<[1], [0], [0], [1], [0, 0, 1, 1], [], []>} : vector<16x32xbf16>, vector<32x1024xbf16>, vector<16x1024xf32> -> vector<16x1024xf32>
    %c0_5 = arith.constant 0 : index
    %c0_6 = arith.constant 0 : index
    %8 = vector.load %arg10[%c0_5, %c0_6] : memref<16x128xbf16, #tpu.memory_space<vmem>>, vector<16x128xbf16>
    %c0_7 = arith.constant 0 : index
    %c0_8 = arith.constant 0 : index
    %9 = vector.load %arg4[%c0_7, %c0_8] : memref<128x1024xbf16, #tpu.memory_space<vmem>>, vector<128x1024xbf16>
    %cst_9 = arith.constant dense<0.000000e+00> : vector<16x1024xf32>
    %10 = tpu.matmul %8, %9, %cst_9 {dimension_numbers = #tpu.dot_dimension_numbers<[1], [0], [0], [1], [0, 0, 1, 1], [], []>} : vector<16x128xbf16>, vector<128x1024xbf16>, vector<16x1024xf32> -> vector<16x1024xf32>
    %11 = arith.addf %7, %10 : vector<16x1024xf32>
    %c0_10 = arith.constant 0 : index
    %c0_11 = arith.constant 0 : index
    %12 = vector.load %arg8[%c0_10, %c0_11] : memref<16x1xf32, #tpu.memory_space<vmem>>, vector<16x1xf32>
    %13 = vector.broadcast %12 : vector<16x1xf32> to vector<16x1024xf32>
    %14 = arith.addf %11, %13 : vector<16x1024xf32>
    %cst_12 = arith.constant 0.000000e+00 : f32
    %15 = vector.broadcast %cst_12 : f32 to vector<16x1024xf32>
    %16 = arith.maximumf %14, %15 : vector<16x1024xf32>
    %c0_13 = arith.constant 0 : index
    %c0_14 = arith.constant 0 : index
    %c0_15 = arith.constant 0 : index
    %17 = vector.load %arg9[%c0_13, %c0_14, %c0_15] : memref<1x16x1024xf32, #tpu.memory_space<vmem>>, vector<1x16x1024xf32>
    %18 = vector.shape_cast %17 : vector<1x16x1024xf32> to vector<16x1024xf32>
    %19 = vector.shape_cast %16 : vector<16x1024xf32> to vector<1x16x1024xf32>
    tpu.vector_store %arg9[%c0_13, %c0_14, %c0_15], %19 {strides = array<i32>} : memref<1x16x1024xf32, #tpu.memory_space<vmem>>, vector<1x16x1024xf32>,
    return
  }
  func.func @transform_0(%arg0: i32, %arg1: i32) -> (i32, i32, i32) {
    %c0_i32 = arith.constant 0 : i32
    %c0_i32_0 = arith.constant 0 : i32
    %c0_i32_1 = arith.constant 0 : i32
    return %arg0, %c0_i32, %c0_i32_0 : i32, i32, i32
  }
  func.func @transform_1(%arg0: i32, %arg1: i32) -> (i32, i32) {
    %c0_i32 = arith.constant 0 : i32
    %c0_i32_0 = arith.constant 0 : i32
    %c0_i32_1 = arith.constant 0 : i32
    return %c0_i32, %c0_i32_0 : i32, i32
  }
  func.func @transform_2(%arg0: i32, %arg1: i32) -> (i32, i32) {
    %c0_i32 = arith.constant 0 : i32
    %c0_i32_0 = arith.constant 0 : i32
    return %c0_i32, %arg1 : i32, i32
  }
  func.func @transform_3(%arg0: i32, %arg1: i32) -> (i32, i32) {
    %c0_i32 = arith.constant 0 : i32
    %c0_i32_0 = arith.constant 0 : i32
    %c0_i32_1 = arith.constant 0 : i32
    return %c0_i32, %c0_i32_0 : i32, i32
  }
  func.func @transform_4(%arg0: i32, %arg1: i32) -> (i32, i32) {
    %c0_i32 = arith.constant 0 : i32
    %c0_i32_0 = arith.constant 0 : i32
    %c0_i32_1 = arith.constant 0 : i32
    return %c0_i32, %c0_i32_0 : i32, i32
  }
  func.func @transform_5(%arg0: i32, %arg1: i32) -> (i32, i32) {
    %c0_i32 = arith.constant 0 : i32
    %c0_i32_0 = arith.constant 0 : i32
    %c0_i32_1 = arith.constant 0 : i32
    return %c0_i32, %c0_i32_0 : i32, i32
  }
  func.func @transform_6(%arg0: i32, %arg1: i32) -> (i32, i32) {
    %c0_i32 = arith.constant 0 : i32
    %c0_i32_0 = arith.constant 0 : i32
    %c0_i32_1 = arith.constant 0 : i32
    return %c0_i32, %c0_i32_0 : i32, i32
  }
  func.func @transform_7(%arg0: i32, %arg1: i32) -> (i32, i32, i32) {
    %c0_i32 = arith.constant 0 : i32
    %c0_i32_0 = arith.constant 0 : i32
    return %arg0, %c0_i32, %arg1 : i32, i32, i32
  }
}

</mosaic_0001>

<bundles_post_ra>
// kernel: _lambda_.1
= control target key start
LH: loop header
LB: loop body
LE: loop exit
PB: predicated region body
PF: predicated region fallthrough
CT: control target
= control target key end

     0   :  { %s2473_s24 = smov 0   ;;  %s2475_s25 = smov 0   ;;  %s3335_s0 = inlined_call_operand.vmem [shape: f32[2,32,1024], index: 0, kind: input, shape index: {}]   ;;  %s3336_s1 = inlined_call_operand.vmem [shape: f32[1024,128], index: 1, kind: input, shape index: {}]   ;;  %s3337_s2 = inlined_call_operand.vmem [shape: bf16[128,1024], index: 2, kind: input, shape index: {}]   ;;  %s3338_s3 = inlined_call_operand.vmem [shape: f32[16,128], index: 3, kind: input, shape index: {}]   ;;  %s3339_s4 = inlined_call_operand.vmem [shape: f32[8,128], index: 4, kind: input, shape index: {}]   ;;  %s3340_s5 = inlined_call_operand.vmem [shape: bf16[16,32], index: 5, kind: input, shape index: {}]   ;;  %s3341_s6 = inlined_call_operand.vmem [shape: f32[16,1], index: 6, kind: input, shape index: {}]   ;;  %s3342_s7 = inlined_call_operand.vmem [shape: f32[2,16,1024], index: 7, kind: output, shape index: {}]  }
   0x1   :  { %s2477_s26 = smov 0  }
   0x2 LB: > { %s29_s27 = sadd.s32 1, %s2426_s25  ;;  %p1893_p0 = scmp.ge.s32.totalorder %s2430_s26, 1  ;;  %s2430_s26 = sphi %s2477_s26, %s17_s26   ;;  %s2426_s25 = sphi %s2475_s25, %s3347_s25   ;;  %s2422_s24 = sphi %s2473_s24, %s3346_s24  }
   0x3   : > { %p31_p1 = scmp.ge.s32.totalorder %s29_s27, 2  ;;  %p262_p2 = scmp.lt.s32.totalorder %s2430_s26, 3 }
   0x5   : > { %s3349_s27 = smov (%p31_p1, %s29_s27), 0  ;;  %p263_p3 = pnand %p1893_p0, %p262_p2 }
   0x7   : > { %266 = sbr.rel (%p263_p3) target bundleno = 846 (0x34e), region = 48 }
   0xe   : > { %v377_v0 = vld [vmem:[%s3336_s1 + $0x80] sm:$0xff]  ;;  %v378_v1 = vld [vmem:[%s3336_s1 + $0x88] sm:$0xff]  ;;  %v379_v11 = vld [vmem:[%s3336_s1 + $0x90] sm:$0xff]  ;;  %p303_p4 = scmp.lt.s32.totalorder %s2422_s24, 1  ;;  %vm1556_vm0 = vcmask 261120  }
   0xf   : > { %v409_v2 = vld [vmem:[%s3336_s1 + $0x180] sm:$0xff]  ;;  %v2204_v3 = vpack.c.bf16 %v378_v1, %v377_v0  ;;  %v410_v4 = vld [vmem:[%s3336_s1 + $0x188] sm:$0xff]  ;;  %v380_v13 = vld [vmem:[%s3336_s1 + $0x98] sm:$0xff] }
  0x10   : > { %v361_v5 = vld [vmem:[%s3336_s1] sm:$0xff]  ;;  %v362_v6 = vld [vmem:[%s3336_s1 + $0x8] sm:$0xff]  ;;  %v2236_v7 = vpack.c.bf16 %v410_v4, %v409_v2  ;;  %v411_v14 = vld [vmem:[%s3336_s1 + $0x190] sm:$0xff]  ;;  %v2208_v16 = vpack.c.bf16 %v380_v13, %v379_v11  ;;  %s3351_s24 = smov (!%p303_p4, %s2422_s24), 1 }
  0x11   : > { %v2206_v8 = vpack.c.bf16 %v362_v6, %v361_v5  ;;  %v393_v9 = vld [vmem:[%s3336_s1 + $0x100] sm:$0xff]  ;;  %v394_v10 = vld [vmem:[%s3336_s1 + $0x108] sm:$0xff]  ;;  %2205 = vmatprep.subr.bf16.mxu0 %v2204_v3  ;;  %v412_v15 = vld [vmem:[%s3336_s1 + $0x198] sm:$0xff]  ;;  %s1973_s17 = sshll.u32 %s3351_s24, 8 }
  0x12   : > { %v2238_v12 = vpack.c.bf16 %v394_v10, %v393_v9  ;;  %2237 = vmatprep.subr.bf16.mxu1 %v2236_v7  ;;  %v2240_v17 = vpack.c.bf16 %v412_v15, %v411_v14  ;;  %v363_v18 = vld [vmem:[%s3336_s1 + $0x10] sm:$0xff]  ;;  %v364_v19 = vld [vmem:[%s3336_s1 + $0x18] sm:$0xff]  ;;  %v381_v23 = vld [vmem:[%s3336_s1 + $0xa0] sm:$0xff]  ;;  %s2653_s13 = scalar_lea.vmem %s3335_s0, %s1973_s17 }
  0x13   : > { %2207 = vmatpush3.bf16.msra.mxu0 %v2206_v8  ;;  %v395_v20 = vld [vmem:[%s3336_s1 + $0x110] sm:$0xff]  ;;  %v2210_v21 = vpack.c.bf16 %v364_v19, %v363_v18  ;;  %v396_v22 = vld [vmem:[%s3336_s1 + $0x118] sm:$0xff]  ;;  %v382_v24 = vld [vmem:[%s3336_s1 + $0xa8] sm:$0xff] }
  0x14   : > { %2239 = vmatpush3.bf16.msra.mxu1 %v2238_v12  ;;  %2209 = vmatprep.subr.bf16.mxu0 %v2208_v16  ;;  %v2242_v25 = vpack.c.bf16 %v396_v22, %v395_v20  ;;  %v2212_v26 = vpack.c.bf16 %v382_v24, %v381_v23  ;;  %v413_v27 = vld [vmem:[%s3336_s1 + $0x1a0] sm:$0xff]  ;;  %v414_v28 = vld [vmem:[%s3336_s1 + $0x1a8] sm:$0xff]  ;;  %v383_v35 = vld [vmem:[%s3336_s1 + $0xb0] sm:$0xff] }
  0x15   : > { %2241 = vmatprep.subr.bf16.mxu1 %v2240_v17  ;;  %v365_v29 = vld [vmem:[%s3336_s1 + $0x20] sm:$0xff]  ;;  %v2244_v30 = vpack.c.bf16 %v414_v28, %v413_v27  ;;  %v366_v31 = vld [vmem:[%s3336_s1 + $0x28] sm:$0xff]  ;;  %v384_v36 = vld [vmem:[%s3336_s1 + $0xb8] sm:$0xff] }
  0x16   : > { %v397_v32 = vld [vmem:[%s3336_s1 + $0x120] sm:$0xff]  ;;  %v398_v33 = vld [vmem:[%s3336_s1 + $0x128] sm:$0xff]  ;;  %v2214_v34 = vpack.c.bf16 %v366_v31, %v365_v29  ;;  %v415_v37 = vld [vmem:[%s3336_s1 + $0x1b0] sm:$0xff]  ;;  %v2216_v39 = vpack.c.bf16 %v384_v36, %v383_v35 }
  0x17   : > { %2211 = vmatpush3.bf16.msra.mxu0 %v2210_v21  ;;  %v2246_v38 = vpack.c.bf16 %v398_v33, %v397_v32  ;;  %v416_v40 = vld [vmem:[%s3336_s1 + $0x1b8] sm:$0xff]  ;;  %v367_v41 = vld [vmem:[%s3336_s1 + $0x30] sm:$0xff]  ;;  %v385_v46 = vld [vmem:[%s3336_s1 + $0xc0] sm:$0xff] }
  0x18   : > { %2243 = vmatpush3.bf16.msra.mxu1 %v2242_v25  ;;  %2213 = vmatprep.subr.bf16.mxu0 %v2212_v26  ;;  %v368_v42 = vld [vmem:[%s3336_s1 + $0x38] sm:$0xff]  ;;  %v2248_v43 = vpack.c.bf16 %v416_v40, %v415_v37  ;;  %v399_v44 = vld [vmem:[%s3336_s1 + $0x130] sm:$0xff]  ;;  %v386_v47 = vld [vmem:[%s3336_s1 + $0xc8] sm:$0xff] }
  0x19   : > { %2245 = vmatprep.subr.bf16.mxu1 %v2244_v30  ;;  %v400_v45 = vld [vmem:[%s3336_s1 + $0x138] sm:$0xff]  ;;  %v417_v48 = vld [vmem:[%s3336_s1 + $0x1c0] sm:$0xff]  ;;  %v418_v49 = vld [vmem:[%s3336_s1 + $0x1c8] sm:$0xff]  ;;  %v2218_v50 = vpack.c.bf16 %v368_v42, %v367_v41  ;;  %v2220_v52 = vpack.c.bf16 %v386_v47, %v385_v46 }
  0x1a   : > { %v2250_v51 = vpack.c.bf16 %v400_v45, %v399_v44  ;;  %v369_v53 = vld [vmem:[%s3336_s1 + $0x40] sm:$0xff]  ;;  %v370_v54 = vld [vmem:[%s3336_s1 + $0x48] sm:$0xff]  ;;  %v2252_v56 = vpack.c.bf16 %v418_v49, %v417_v48  ;;  %v387_v58 = vld [vmem:[%s3336_s1 + $0xd0] sm:$0xff] }
  0x1b   : > { %2215 = vmatpush3.bf16.msra.mxu0 %v2214_v34  ;;  %v401_v55 = vld [vmem:[%s3336_s1 + $0x140] sm:$0xff]  ;;  %v402_v57 = vld [vmem:[%s3336_s1 + $0x148] sm:$0xff]  ;;  %v388_v59 = vld [vmem:[%s3336_s1 + $0xd8] sm:$0xff]  ;;  %v2222_v62 = vpack.c.bf16 %v370_v54, %v369_v53 }
  0x1c   : > { %2247 = vmatpush3.bf16.msra.mxu1 %v2246_v38  ;;  %2217 = vmatprep.subr.bf16.mxu0 %v2216_v39  ;;  %v419_v60 = vld [vmem:[%s3336_s1 + $0x1d0] sm:$0xff]  ;;  %v420_v61 = vld [vmem:[%s3336_s1 + $0x1d8] sm:$0xff]  ;;  %v2254_v63 = vpack.c.bf16 %v402_v57, %v401_v55  ;;  %v2224_v0 = vpack.c.bf16 %v388_v59, %v387_v58  ;;  %v389_v6 = vld [vmem:[%s3336_s1 + $0xe0] sm:$0xff] }
  0x1d   : > { %2249 = vmatprep.subr.bf16.mxu1 %v2248_v43  ;;  %v371_v1 = vld [vmem:[%s3336_s1 + $0x50] sm:$0xff]  ;;  %v372_v2 = vld [vmem:[%s3336_s1 + $0x58] sm:$0xff]  ;;  %v2256_v4 = vpack.c.bf16 %v420_v61, %v419_v60  ;;  %v390_v7 = vld [vmem:[%s3336_s1 + $0xe8] sm:$0xff] }
  0x1e   : > { %v403_v3 = vld [vmem:[%s3336_s1 + $0x150] sm:$0xff]  ;;  %v404_v5 = vld [vmem:[%s3336_s1 + $0x158] sm:$0xff]  ;;  %v421_v8 = vld [vmem:[%s3336_s1 + $0x1e0] sm:$0xff]  ;;  %v2226_v10 = vpack.c.bf16 %v372_v2, %v371_v1  ;;  %v2228_v14 = vpack.c.bf16 %v390_v7, %v389_v6 }
  0x1f   : > { %2219 = vmatpush3.bf16.msra.mxu0 %v2218_v50  ;;  %v422_v9 = vld [vmem:[%s3336_s1 + $0x1e8] sm:$0xff]  ;;  %v373_v11 = vld [vmem:[%s3336_s1 + $0x60] sm:$0xff]  ;;  %v2258_v13 = vpack.c.bf16 %v404_v5, %v403_v3  ;;  %v332_v17 = vld [vmem:[%s2653_s13 + $0x18] sm:$0xff] }
  0x20   : > { %2251 = vmatpush3.bf16.msra.mxu1 %v2250_v51  ;;  %2221 = vmatprep.subr.bf16.mxu0 %v2220_v52  ;;  %v374_v12 = vld [vmem:[%s3336_s1 + $0x68] sm:$0xff]  ;;  %v405_v15 = vld [vmem:[%s3336_s1 + $0x160] sm:$0xff]  ;;  %v2260_v18 = vpack.c.bf16 %v422_v9, %v421_v8  ;;  %v391_v20 = vld [vmem:[%s3336_s1 + $0xf0] sm:$0xff] }
  0x21   : > { %2253 = vmatprep.subr.bf16.mxu1 %v2252_v56  ;;  %v330_v16 = vld [vmem:[%s2653_s13 + $0x8] sm:$0xff]  ;;  %v392_v21 = vld [vmem:[%s3336_s1 + $0xf8] sm:$0xff]  ;;  %v423_v22 = vld [vmem:[%s3336_s1 + $0x1f0] sm:$0xff]  ;;  %638 = vmatprep.mubr.f32.mxu1 %v332_v17  ;;  %v2230_v24 = vpack.c.bf16 %v374_v12, %v373_v11 }
  0x22   : > { %v406_v19 = vld [vmem:[%s3336_s1 + $0x168] sm:$0xff]  ;;  %553 = vmatprep.mubr.f32.mxu0 %v330_v16  ;;  %v424_v23 = vld [vmem:[%s3336_s1 + $0x1f8] sm:$0xff]  ;;  %v2232_v26 = vpack.c.bf16 %v392_v21, %v391_v20  ;;  %v375_v27 = vld [vmem:[%s3336_s1 + $0x70] sm:$0xff] }
  0x23   : > { %2223 = vmatpush3.bf16.msra.mxu0 %v2222_v62  ;;  %v2262_v25 = vpack.c.bf16 %v406_v19, %v405_v15  ;;  %v376_v28 = vld [vmem:[%s3336_s1 + $0x78] sm:$0xff]  ;;  %v407_v29 = vld [vmem:[%s3336_s1 + $0x170] sm:$0xff]  ;;  %v2264_v30 = vpack.c.bf16 %v424_v23, %v423_v22  ;;  %v441_v32 = vld [vmem:[%s3336_s1 + $0x280] sm:$0xff] }
  0x24   : > { %2255 = vmatpush3.bf16.msra.mxu1 %v2254_v63  ;;  %2225 = vmatprep.subr.bf16.mxu0 %v2224_v0  ;;  %v408_v31 = vld [vmem:[%s3336_s1 + $0x178] sm:$0xff]  ;;  %v442_v33 = vld [vmem:[%s3336_s1 + $0x288] sm:$0xff]  ;;  %v473_v34 = vld [vmem:[%s3336_s1 + $0x380] sm:$0xff]  ;;  %v2234_v36 = vpack.c.bf16 %v376_v28, %v375_v27 }
  0x25   : > { %2257 = vmatprep.subr.bf16.mxu1 %v2256_v4  ;;  %v474_v35 = vld [vmem:[%s3336_s1 + $0x388] sm:$0xff]  ;;  %v2266_v37 = vpack.c.bf16 %v408_v31, %v407_v29  ;;  %v2268_v38 = vpack.c.bf16 %v442_v33, %v441_v32  ;;  %v425_v39 = vld [vmem:[%s3336_s1 + $0x200] sm:$0xff]  ;;  %v443_v44 = vld [vmem:[%s3336_s1 + $0x290] sm:$0xff] }
  0x26   : > { %v426_v40 = vld [vmem:[%s3336_s1 + $0x208] sm:$0xff]  ;;  %v457_v41 = vld [vmem:[%s3336_s1 + $0x300] sm:$0xff]  ;;  %v2300_v42 = vpack.c.bf16 %v474_v35, %v473_v34  ;;  %v444_v45 = vld [vmem:[%s3336_s1 + $0x298] sm:$0xff] }
  0x27   : > { %2227 = vmatpush3.bf16.msra.mxu0 %v2226_v10  ;;  %v458_v43 = vld [vmem:[%s3336_s1 + $0x308] sm:$0xff]  ;;  %v475_v46 = vld [vmem:[%s3336_s1 + $0x390] sm:$0xff]  ;;  %v476_v47 = vld [vmem:[%s3336_s1 + $0x398] sm:$0xff]  ;;  %v2270_v50 = vpack.c.bf16 %v426_v40, %v425_v39  ;;  %v2272_v52 = vpack.c.bf16 %v444_v45, %v443_v44 }
  0x28   : > { %2259 = vmatpush3.bf16.msra.mxu1 %v2258_v13  ;;  %2229 = vmatprep.subr.bf16.mxu0 %v2228_v14  ;;  %v2736_v48 = vld [vmem:[%s2653_s13] sm:$0xff]  ;;  %v331_v49 = vld [vmem:[%s2653_s13 + $0x10] sm:$0xff]  ;;  %v2302_v51 = vpack.c.bf16 %v458_v43, %v457_v41  ;;  %v428_v54 = vld [vmem:[%s3336_s1 + $0x218] sm:$0xff]  ;;  %v2304_v56 = vpack.c.bf16 %v476_v47, %v475_v46 }
  0x29   : > { %2261 = vmatprep.subr.bf16.mxu1 %v2260_v18  ;;  %v427_v53 = vld [vmem:[%s3336_s1 + $0x210] sm:$0xff]  ;;  %v460_v57 = vld [vmem:[%s3336_s1 + $0x318] sm:$0xff]  ;;  %v445_v58 = vld [vmem:[%s3336_s1 + $0x2a0] sm:$0xff] }
  0x2a   : > { %v459_v55 = vld [vmem:[%s3336_s1 + $0x310] sm:$0xff]  ;;  %v446_v59 = vld [vmem:[%s3336_s1 + $0x2a8] sm:$0xff]  ;;  %v477_v60 = vld [vmem:[%s3336_s1 + $0x3a0] sm:$0xff]  ;;  %v2274_v63 = vpack.c.bf16 %v428_v54, %v427_v53 }
  0x2b   : > { %2231 = vmatpush3.bf16.msra.mxu0 %v2230_v24  ;;  %v478_v61 = vld [vmem:[%s3336_s1 + $0x3a8] sm:$0xff]  ;;  %v429_v0 = vld [vmem:[%s3336_s1 + $0x220] sm:$0xff]  ;;  %v2771_v1 = vld [vmem:[%s2653_s13 + $0x58] sm:$0xff]  ;;  %v2306_v3 = vpack.c.bf16 %v460_v57, %v459_v55  ;;  %v2276_v4 = vpack.c.bf16 %v446_v59, %v445_v58 }
  0x2c   : > { %2263 = vmatpush3.bf16.msra.mxu1 %v2262_v25  ;;  %2233 = vmatprep.subr.bf16.mxu0 %v2232_v26  ;;  %v2765_v62 = vld [vmem:[%s2653_s13 + $0x48] sm:$0xff]  ;;  %v2774_v2 = vld [vmem:[%s2653_s13 + $0x40] sm:$0xff]  ;;  %v2783_v7 = vld [vmem:[%s2653_s13 + $0x50] sm:$0xff]  ;;  %v2308_v8 = vpack.c.bf16 %v478_v61, %v477_v60 }
  0x2d   : > { %2265 = vmatprep.subr.bf16.mxu1 %v2264_v30  ;;  %v430_v5 = vld [vmem:[%s3336_s1 + $0x228] sm:$0xff]  ;;  %v461_v6 = vld [vmem:[%s3336_s1 + $0x320] sm:$0xff]  ;;  %v447_v10 = vld [vmem:[%s3336_s1 + $0x2b0] sm:$0xff] }
  0x2e   : > { %v462_v9 = vld [vmem:[%s3336_s1 + $0x328] sm:$0xff]  ;;  %v448_v11 = vld [vmem:[%s3336_s1 + $0x2b8] sm:$0xff]  ;;  %v479_v12 = vld [vmem:[%s3336_s1 + $0x3b0] sm:$0xff]  ;;  %v2278_v15 = vpack.c.bf16 %v430_v5, %v429_v0 }
  0x2f   : > { %2235 = vmatpush3.bf16.msra.mxu0 %v2234_v36  ;;  %v480_v13 = vld [vmem:[%s3336_s1 + $0x3b8] sm:$0xff]  ;;  %v2804_v14 = vld [vmem:[%s2653_s13 + $0x88] sm:$0xff]  ;;  %v431_v16 = vld [vmem:[%s3336_s1 + $0x230] sm:$0xff]  ;;  %v2310_v19 = vpack.c.bf16 %v462_v9, %v461_v6  ;;  %v2280_v20 = vpack.c.bf16 %v448_v11, %v447_v10 }
  0x30   : > { %2267 = vmatpush3.bf16.msra.mxu1 %v2266_v37  ;;  %2269 = vmatprep.subr.bf16.mxu0 %v2268_v38  ;;  %v2811_v17 = vld [vmem:[%s2653_s13 + $0x98] sm:$0xff]  ;;  %v2814_v18 = vld [vmem:[%s2653_s13 + $0x80] sm:$0xff]  ;;  %v463_v22 = vld [vmem:[%s3336_s1 + $0x330] sm:$0xff]  ;;  %v2312_v24 = vpack.c.bf16 %v480_v13, %v479_v12 }
  0x31   : > { %2301 = vmatprep.subr.bf16.mxu1 %v2300_v42  ;;  %v432_v21 = vld [vmem:[%s3336_s1 + $0x238] sm:$0xff]  ;;  %v2823_v23 = vld [vmem:[%s2653_s13 + $0x90] sm:$0xff]  ;;  %v449_v26 = vld [vmem:[%s3336_s1 + $0x2c0] sm:$0xff] }
  0x32   : > { %554 = vmatmul.mubr.f32.vlgmr.msra.gmra.mrb[0].mxu0 %v2736_v48  ;;  %v464_v25 = vld [vmem:[%s3336_s1 + $0x338] sm:$0xff]  ;;  %v450_v27 = vld [vmem:[%s3336_s1 + $0x2c8] sm:$0xff]  ;;  %v481_v28 = vld [vmem:[%s3336_s1 + $0x3c0] sm:$0xff]  ;;  %v2282_v31 = vpack.c.bf16 %v432_v21, %v431_v16 }
  0x33   : > { %639 = vmatmul.mubr.f32.vlgmr.msra.gmra.mrb[0].mxu1 %v331_v49  ;;  %2271 = vmatpush3.bf16.msra.mxu0 %v2270_v50  ;;  %v482_v29 = vld [vmem:[%s3336_s1 + $0x3c8] sm:$0xff]  ;;  %v433_v32 = vld [vmem:[%s3336_s1 + $0x240] sm:$0xff]  ;;  %v2851_v33 = vld [vmem:[%s2653_s13 + $0xd8] sm:$0xff]  ;;  %v2314_v35 = vpack.c.bf16 %v464_v25, %v463_v22  ;;  %v2284_v36 = vpack.c.bf16 %v450_v27, %v449_v26 }
  0x34   : > { %2303 = vmatpush3.bf16.msra.mxu1 %v2302_v51  ;;  %2273 = vmatprep.subr.bf16.mxu0 %v2272_v52  ;;  %v2844_v30 = vld [vmem:[%s2653_s13 + $0xc8] sm:$0xff]  ;;  %v2854_v34 = vld [vmem:[%s2653_s13 + $0xc0] sm:$0xff]  ;;  %v2863_v39 = vld [vmem:[%s2653_s13 + $0xd0] sm:$0xff]  ;;  %v2316_v40 = vpack.c.bf16 %v482_v29, %v481_v28 }
  0x35   : > { %2305 = vmatprep.subr.bf16.mxu1 %v2304_v56  ;;  %558 = vmatprep.mubr.f32.mxu0 %v2765_v62  ;;  %v434_v37 = vld [vmem:[%s3336_s1 + $0x248] sm:$0xff]  ;;  %v465_v38 = vld [vmem:[%s3336_s1 + $0x340] sm:$0xff]  ;;  %v451_v42 = vld [vmem:[%s3336_s1 + $0x2d0] sm:$0xff] }
  0x36   : > { %643 = vmatprep.mubr.f32.mxu1 %v2771_v1  ;;  %559 = vmatmul.mubr.f32.gmra.mrb[2].mxu0 %v2774_v2  ;;  %v466_v41 = vld [vmem:[%s3336_s1 + $0x348] sm:$0xff]  ;;  %v452_v43 = vld [vmem:[%s3336_s1 + $0x2d8] sm:$0xff]  ;;  %v483_v44 = vld [vmem:[%s3336_s1 + $0x3d0] sm:$0xff]  ;;  %v2286_v46 = vpack.c.bf16 %v434_v37, %v433_v32 }
  0x37   : > { %2275 = vmatpush3.bf16.msra.mxu0 %v2274_v63  ;;  %644 = vmatmul.mubr.f32.gmra.mrb[2].mxu1 %v2783_v7  ;;  %v484_v45 = vld [vmem:[%s3336_s1 + $0x3d8] sm:$0xff]  ;;  %v2885_v47 = vld [vmem:[%s2653_s13 + $0x28] sm:$0xff]  ;;  %v2318_v50 = vpack.c.bf16 %v466_v41, %v465_v38  ;;  %v2288_v51 = vpack.c.bf16 %v452_v43, %v451_v42  ;;  %v435_v52 = vld [vmem:[%s3336_s1 + $0x250] sm:$0xff] }
  0x38   : > { %2307 = vmatpush3.bf16.msra.mxu1 %v2306_v3  ;;  %2277 = vmatprep.subr.bf16.mxu0 %v2276_v4  ;;  %v2888_v49 = vld [vmem:[%s2653_s13 + $0x38] sm:$0xff]  ;;  %v467_v54 = vld [vmem:[%s3336_s1 + $0x350] sm:$0xff]  ;;  %v2320_v55 = vpack.c.bf16 %v484_v45, %v483_v44  ;;  %v453_v57 = vld [vmem:[%s3336_s1 + $0x2e0] sm:$0xff] }
  0x39   : > { %2309 = vmatprep.subr.bf16.mxu1 %v2308_v8  ;;  %563 = vmatprep.mubr.f32.mxu0 %v2804_v14  ;;  %v436_v53 = vld [vmem:[%s3336_s1 + $0x258] sm:$0xff]  ;;  %v454_v58 = vld [vmem:[%s3336_s1 + $0x2e8] sm:$0xff]  ;;  %v485_v59 = vld [vmem:[%s3336_s1 + $0x3e0] sm:$0xff] }
  0x3a   : > { %648 = vmatprep.mubr.f32.mxu1 %v2811_v17  ;;  %564 = vmatmul.mubr.f32.gmra.mrb[4].mxu0 %v2814_v18  ;;  %v468_v56 = vld [vmem:[%s3336_s1 + $0x358] sm:$0xff]  ;;  %v486_v60 = vld [vmem:[%s3336_s1 + $0x3e8] sm:$0xff]  ;;  %v2290_v61 = vpack.c.bf16 %v436_v53, %v435_v52  ;;  %v437_v63 = vld [vmem:[%s3336_s1 + $0x260] sm:$0xff]  ;;  %v2292_v4 = vpack.c.bf16 %v454_v58, %v453_v57 }
  0x3b   : > { %2279 = vmatpush3.bf16.msra.mxu0 %v2278_v15  ;;  %649 = vmatmul.mubr.f32.gmra.mrb[4].mxu1 %v2823_v23  ;;  %v438_v0 = vld [vmem:[%s3336_s1 + $0x268] sm:$0xff]  ;;  %v2322_v3 = vpack.c.bf16 %v468_v56, %v467_v54  ;;  %v469_v5 = vld [vmem:[%s3336_s1 + $0x360] sm:$0xff]  ;;  %v2324_v6 = vpack.c.bf16 %v486_v60, %v485_v59  ;;  %v455_v9 = vld [vmem:[%s3336_s1 + $0x2f0] sm:$0xff] }
  0x3c   : > { %2311 = vmatpush3.bf16.msra.mxu1 %v2310_v19  ;;  %2281 = vmatprep.subr.bf16.mxu0 %v2280_v20  ;;  %v470_v8 = vld [vmem:[%s3336_s1 + $0x368] sm:$0xff]  ;;  %v456_v10 = vld [vmem:[%s3336_s1 + $0x2f8] sm:$0xff]  ;;  %v487_v11 = vld [vmem:[%s3336_s1 + $0x3f0] sm:$0xff]  ;;  %v2294_v13 = vpack.c.bf16 %v438_v0, %v437_v63 }
  0x3d   : > { %2313 = vmatprep.subr.bf16.mxu1 %v2312_v24  ;;  %568 = vmatprep.mubr.f32.mxu0 %v2844_v30  ;;  %v488_v12 = vld [vmem:[%s3336_s1 + $0x3f8] sm:$0xff]  ;;  %v2326_v15 = vpack.c.bf16 %v470_v8, %v469_v5  ;;  %v2296_v16 = vpack.c.bf16 %v456_v10, %v455_v9  ;;  %v439_v19 = vld [vmem:[%s3336_s1 + $0x270] sm:$0xff]  ;;  %v2953_v27 = vld [vmem:[%s2653_s13 + $0x20] sm:$0xff] }
  0x3e   : > { %653 = vmatprep.mubr.f32.mxu1 %v2851_v33  ;;  %569 = vmatmul.mubr.f32.gmra.mrb[6].mxu0 %v2854_v34  ;;  %v440_v20 = vld [vmem:[%s3336_s1 + $0x278] sm:$0xff]  ;;  %v2328_v21 = vpack.c.bf16 %v488_v12, %v487_v11  ;;  %v471_v22 = vld [vmem:[%s3336_s1 + $0x370] sm:$0xff]  ;;  %v2959_v29 = vld [vmem:[%s2653_s13 + $0x68] sm:$0xff] }
  0x3f   : > { %2283 = vmatpush3.bf16.msra.mxu0 %v2282_v31  ;;  %654 = vmatmul.mubr.f32.gmra.mrb[6].mxu1 %v2863_v39  ;;  %v472_v24 = vld [vmem:[%s3336_s1 + $0x378] sm:$0xff]  ;;  %v2298_v25 = vpack.c.bf16 %v440_v20, %v439_v19  ;;  %v2956_v28 = vld [vmem:[%s2653_s13 + $0x30] sm:$0xff]  ;;  %v2968_v32 = vld [vmem:[%s2653_s13 + $0x60] sm:$0xff] }
  0x40   : > { %2315 = vmatpush3.bf16.msra.mxu1 %v2314_v35  ;;  %2285 = vmatprep.subr.bf16.mxu0 %v2284_v36  ;;  %v2330_v26 = vpack.c.bf16 %v472_v24, %v471_v22  ;;  %v2962_v31 = vld [vmem:[%s2653_s13 + $0x78] sm:$0xff]  ;;  %v2972_v35 = vld [vmem:[%s2653_s13 + $0x70] sm:$0xff]  ;;  %v2975_v36 = vld [vmem:[%s2653_s13 + $0xa8] sm:$0xff] }
  0x41   : > { %2317 = vmatprep.subr.bf16.mxu1 %v2316_v40  ;;  %723 = vmatprep.mubr.f32.mxu0 %v2885_v47  ;;  %v2978_v37 = vld [vmem:[%s2653_s13 + $0xb8] sm:$0xff]  ;;  %v2984_v38 = vld [vmem:[%s2653_s13 + $0xa0] sm:$0xff]  ;;  %v2988_v40 = vld [vmem:[%s2653_s13 + $0xb0] sm:$0xff] }
  0x42   : > { %808 = vmatprep.mubr.f32.mxu1 %v2888_v49  ;;  %v2991_v41 = vld [vmem:[%s2653_s13 + $0xe8] sm:$0xff]  ;;  %v2994_v42 = vld [vmem:[%s2653_s13 + $0xf8] sm:$0xff]  ;;  %v3000_v43 = vld [vmem:[%s2653_s13 + $0xe0] sm:$0xff] }
  0x43   : > { %2287 = vmatpush3.bf16.msra.mxu0 %v2286_v46  ;;  %v3004_v44 = vld [vmem:[%s2653_s13 + $0xf0] sm:$0xff]  ;;  %v865_v45 = vld [vmem:[%s3338_s3] sm:$0xff] }
  0x44   : > { %2319 = vmatpush3.bf16.msra.mxu1 %v2318_v50  ;;  %2289 = vmatprep.subr.bf16.mxu0 %v2288_v51  ;;  %3344 = vst [vmem:[#allocation3_spill] sm:$0xff] %v3004_v44  ;;  %v995_v46 = vld [vmem:[%s3337_s2] sm:$0xff] }
  0x45   : > { %2321 = vmatprep.subr.bf16.mxu1 %v2320_v55  ;;  %v999_v50 = vld [vmem:[%s3337_s2 + $0x20] sm:$0xff] }
  0x46   : > { %v1902_v51 = vcombine.low %v995_v46, %v999_v50  ;;  %v1903_v52 = vcombine.high %v995_v46, %v999_v50  ;;  %v1003_v53 = vld [vmem:[%s3337_s2 + $0x40] sm:$0xff] }
  0x47   : > { %2291 = vmatpush3.bf16.msra.mxu0 %v2290_v61  ;;  %v1007_v54 = vld [vmem:[%s3337_s2 + $0x60] sm:$0xff] }
  0x48   : > { %2323 = vmatpush3.bf16.msra.mxu1 %v2322_v3  ;;  %2293 = vmatprep.subr.bf16.mxu0 %v2292_v4  ;;  %v1911_v55 = vcombine.high %v1003_v53, %v1007_v54  ;;  %v1910_v56 = vcombine.low %v1003_v53, %v1007_v54  ;;  %v1011_v57 = vld [vmem:[%s3337_s2 + $0x80] sm:$0xff] }
  0x49   : > { %2325 = vmatprep.subr.bf16.mxu1 %v2324_v6  ;;  %v1015_v58 = vld [vmem:[%s3337_s2 + $0xa0] sm:$0xff] }
  0x4a   : > { %v1919_v59 = vcombine.high %v1011_v57, %v1015_v58  ;;  %v1918_v60 = vcombine.low %v1011_v57, %v1015_v58  ;;  %v1019_v61 = vld [vmem:[%s3337_s2 + $0xc0] sm:$0xff] }
  0x4b   : > { %2295 = vmatpush3.bf16.msra.mxu0 %v2294_v13  ;;  %v1023_v63 = vld [vmem:[%s3337_s2 + $0xe0] sm:$0xff] }
  0x4c   : > { %2327 = vmatpush3.bf16.msra.mxu1 %v2326_v15  ;;  %2297 = vmatprep.subr.bf16.mxu0 %v2296_v16  ;;  %v1927_v0 = vcombine.high %v1019_v61, %v1023_v63  ;;  %v1926_v3 = vcombine.low %v1019_v61, %v1023_v63  ;;  %v1027_v4 = vld [vmem:[%s3337_s2 + $0x100] sm:$0xff] }
  0x4d   : > { %2329 = vmatprep.subr.bf16.mxu1 %v2328_v21  ;;  %v1031_v5 = vld [vmem:[%s3337_s2 + $0x120] sm:$0xff] }
  0x4e   : > { %v1935_v6 = vcombine.high %v1027_v4, %v1031_v5  ;;  %v1934_v8 = vcombine.low %v1027_v4, %v1031_v5  ;;  %v1035_v9 = vld [vmem:[%s3337_s2 + $0x140] sm:$0xff] }
  0x4f   : > { %2299 = vmatpush3.bf16.msra.mxu0 %v2298_v25  ;;  %v1039_v10 = vld [vmem:[%s3337_s2 + $0x160] sm:$0xff] }
  0x50   : > { %2331 = vmatpush3.bf16.msra.mxu1 %v2330_v26  ;;  %v1943_v11 = vcombine.high %v1035_v9, %v1039_v10  ;;  %v1942_v12 = vcombine.low %v1035_v9, %v1039_v10  ;;  %v1043_v13 = vld [vmem:[%s3337_s2 + $0x180] sm:$0xff] }
  0x51   : > { %1379 = vmatprep.subr.bf16.mxu1 %v1903_v52  ;;  %v1047_v15 = vld [vmem:[%s3337_s2 + $0x1a0] sm:$0xff] }
  0x52   : > { %724 = vmatmul.mubr.f32.vlgmr.msra.gmra.mrb[8].mxu0 %v2953_v27  ;;  %v1951_v16 = vcombine.high %v1043_v13, %v1047_v15  ;;  %v1950_v19 = vcombine.low %v1043_v13, %v1047_v15  ;;  %v1051_v20 = vld [vmem:[%s3337_s2 + $0x1c0] sm:$0xff] }
  0x53   : > { %809 = vmatmul.mubr.f32.vlgmr.msra.gmra.mrb[8].mxu1 %v2956_v28  ;;  %728 = vmatprep.mubr.f32.mxu0 %v2959_v29  ;;  %v1055_v21 = vld [vmem:[%s3337_s2 + $0x1e0] sm:$0xff] }
  0x54   : > { %813 = vmatprep.mubr.f32.mxu1 %v2962_v31  ;;  %1380 = vmatpush1.bf16.msra.mxu1 %v1902_v51  ;;  %v1959_v22 = vcombine.high %v1051_v20, %v1055_v21  ;;  %v1958_v24 = vcombine.low %v1051_v20, %v1055_v21 }
  0x55   : > { %1381 = vmatprep.subr.bf16.mxu1 %v1911_v55 }
  0x56   : > { %729 = vmatmul.mubr.f32.gmra.mrb[10].mxu0 %v2968_v32 }
  0x57   : > { %814 = vmatmul.mubr.f32.gmra.mrb[10].mxu1 %v2972_v35  ;;  %733 = vmatprep.mubr.f32.mxu0 %v2975_v36 }
  0x58   : > { %818 = vmatprep.mubr.f32.mxu1 %v2978_v37  ;;  %1382 = vmatpush1.bf16.msra.mxu1 %v1910_v56 }
  0x59   : > { %1383 = vmatprep.subr.bf16.mxu1 %v1919_v59 }
  0x5a   : > { %734 = vmatmul.mubr.f32.gmra.mrb[12].mxu0 %v2984_v38 }
  0x5b   : > { %819 = vmatmul.mubr.f32.gmra.mrb[12].mxu1 %v2988_v40  ;;  %738 = vmatprep.mubr.f32.mxu0 %v2991_v41 }
  0x5c   : > { %823 = vmatprep.mubr.f32.mxu1 %v2994_v42  ;;  %1384 = vmatpush1.bf16.msra.mxu1 %v1918_v60 }
  0x5d   : > { %1385 = vmatprep.subr.bf16.mxu1 %v1927_v0 }
  0x5e   : > { %739 = vmatmul.mubr.f32.gmra.mrb[14].mxu0 %v3000_v43 }
  0x5f   : > { %824 = vmatmul.mubr.f32.gmra.mrb[14].mxu1 %v3004_v44  ;;  %2201 = vmatprep.mubr.f32.mxu0 %v865_v45 }
  0x60   : > { %1386 = vmatpush1.bf16.msra.mxu1 %v1926_v3 }
  0x61   : > { %1387 = vmatprep.subr.bf16.mxu1 %v1935_v6 }
  0x64   : > { %1388 = vmatpush1.bf16.msra.mxu1 %v1934_v8 }
  0x65   : > { %1389 = vmatprep.subr.bf16.mxu1 %v1943_v11 }
  0x68   : > { %1390 = vmatpush1.bf16.msra.mxu1 %v1942_v12 }
  0x69   : > { %1391 = vmatprep.subr.bf16.mxu1 %v1951_v16 }
  0x6c   : > { %1392 = vmatpush1.bf16.msra.mxu1 %v1950_v19 }
  0x6d   : > { %1393 = vmatprep.subr.bf16.mxu1 %v1959_v22 }
  0x70   : > { %1394 = vmatpush1.bf16.msra.mxu1 %v1958_v24 }
 0x105   : > { %v2007_v25 = vpop.f32.mrb[0].mxu0 }
 0x106   : > { %v2051_v26 = vpop.f32.mrb[0].mxu1  ;;  %v2008_v45 = vpop.f32.mrb[1].mxu0 }
 0x107   : > { %v2009_v46 = vadd.f32 %v2008_v45, %v2007_v25  ;;  %v2052_v50 = vpop.f32.mrb[1].mxu1 }
 0x108   : > { %v2053_v51 = vadd.f32 %v2052_v50, %v2051_v26 }
 0x109   : > { %v2010_v52 = vpop.f32.mrb[2].mxu0 }
 0x10a   : > { %v641_v53 = vadd.f32 %v2053_v51, %v2009_v46  ;;  %v2054_v54 = vpop.f32.mrb[2].mxu1  ;;  %v2011_v55 = vpop.f32.mrb[3].mxu0 }
 0x10b   : > { %v2012_v56 = vadd.f32 %v2011_v55, %v2010_v52  ;;  %v2055_v57 = vpop.f32.mrb[3].mxu1 }
 0x10c   : > { %v2056_v58 = vadd.f32 %v2055_v57, %v2054_v54  ;;  %v1899_v57 = vld [vmem:[%s3339_s4 + $0x1] ss:$0 sm:$0xff] }
 0x10d   : > { %v2013_v59 = vpop.f32.mrb[4].mxu0 }
 0x10e   : > { %v646_v60 = vadd.f32 %v2056_v58, %v2012_v56  ;;  %v2057_v61 = vpop.f32.mrb[4].mxu1  ;;  %v2014_v63 = vpop.f32.mrb[5].mxu0  ;;  %v1898_v56 = vld [vmem:[%s3339_s4] ss:$0 sm:$0xff] }
 0x10f   : > { %v2015_v0 = vadd.f32 %v2014_v63, %v2013_v59  ;;  %v2058_v3 = vpop.f32.mrb[5].mxu1 }
 0x110   : > { %v2059_v4 = vadd.f32 %v2058_v3, %v2057_v61 }
 0x111   : > { %v2016_v5 = vpop.f32.mrb[6].mxu0 }
 0x112   : > { %v651_v6 = vadd.f32 %v2059_v4, %v2015_v0  ;;  %v2060_v8 = vpop.f32.mrb[6].mxu1  ;;  %v2017_v9 = vpop.f32.mrb[7].mxu0  ;;  %v1900_v0 = vld [vmem:[%s3339_s4 + $0x2] ss:$0 sm:$0xff] }
 0x113   : > { %v2018_v10 = vadd.f32 %v2017_v9, %v2016_v5  ;;  %v2061_v11 = vpop.f32.mrb[7].mxu1 }
 0x114   : > { %v2062_v12 = vadd.f32 %v2061_v11, %v2060_v8 }
 0x116   : > { %v656_v13 = vadd.f32 %v2062_v12, %v2018_v10 }
 0x125   : > { %v2095_v15 = vpop.f32.mrb[8].mxu0 }
 0x126   : > { %v2096_v16 = vpop.f32.mrb[9].mxu0  ;;  %v2139_v19 = vpop.f32.mrb[8].mxu1 }
 0x127   : > { %v2097_v20 = vadd.f32 %v2096_v16, %v2095_v15  ;;  %v2140_v21 = vpop.f32.mrb[9].mxu1 }
 0x128   : > { %v2141_v22 = vadd.f32 %v2140_v21, %v2139_v19 }
 0x129   : > { %v726_v24 = vadd.f32 %v2097_v20, %v641_v53  ;;  %v2098_v25 = vpop.f32.mrb[10].mxu0 }
 0x12a   : > { %v2099_v26 = vpop.f32.mrb[11].mxu0  ;;  %v2142_v45 = vpop.f32.mrb[10].mxu1 }
 0x12b   : > { %v811_v46 = vadd.f32 %v2141_v22, %v726_v24  ;;  %v2100_v50 = vadd.f32 %v2099_v26, %v2098_v25  ;;  %v2143_v51 = vpop.f32.mrb[11].mxu1 }
 0x12c   : > { %v2144_v52 = vadd.f32 %v2143_v51, %v2142_v45 }
 0x12d   : > { %v731_v54 = vadd.f32 %v2100_v50, %v646_v60  ;;  %v2101_v55 = vpop.f32.mrb[12].mxu0  ;;  %v1901_v60 = vld [vmem:[%s3339_s4 + $0x3] ss:$0 sm:$0xff]  ;;  %v834_v4 = vmul.f32 %v1898_v56, %v811_v46  ;;  %v843_v5 = vmul.f32 %v1899_v57, %v811_v46  ;;  %v852_v19 = vmul.f32 %v1900_v0, %v811_v46 }
 0x12e   : > { %v2102_v58 = vpop.f32.mrb[13].mxu0  ;;  %v2145_v59 = vpop.f32.mrb[12].mxu1  ;;  %v861_v20 = vmul.f32 %v1901_v60, %v811_v46 }
 0x12f   : > { %v816_v53 = vadd.f32 %v2144_v52, %v731_v54  ;;  %v2103_v61 = vadd.f32 %v2102_v58, %v2101_v55  ;;  %v2146_v63 = vpop.f32.mrb[13].mxu1 }
 0x130   : > { %v2147_v3 = vadd.f32 %v2146_v63, %v2145_v59 }
 0x131   : > { %v736_v8 = vadd.f32 %v2103_v61, %v651_v6  ;;  %v2104_v9 = vpop.f32.mrb[14].mxu0  ;;  %v835_v10 = vmul.f32 %v1898_v56, %v816_v53  ;;  %v844_v11 = vmul.f32 %v1899_v57, %v816_v53  ;;  %v853_v12 = vmul.f32 %v1900_v0, %v816_v53 }
 0x132   : > { %v2105_v15 = vpop.f32.mrb[15].mxu0  ;;  %v2148_v16 = vpop.f32.mrb[14].mxu1  ;;  %v862_v21 = vmul.f32 %v1901_v60, %v816_v53 }
 0x133   : > { %v821_v22 = vadd.f32 %v2147_v3, %v736_v8  ;;  %v2106_v24 = vadd.f32 %v2105_v15, %v2104_v9  ;;  %v2149_v25 = vpop.f32.mrb[15].mxu1  ;;  %v2332_v26 = vpack.c.bf16 %v835_v10, %v834_v4  ;;  %v2340_v45 = vpack.c.bf16 %v844_v11, %v843_v5  ;;  %v1012_v11 = vld [vmem:[%s3337_s2 + $0x88] sm:$0xff] }
 0x134   : > { %v2150_v50 = vadd.f32 %v2149_v25, %v2148_v16  ;;  %v2348_v51 = vpack.c.bf16 %v853_v12, %v852_v19  ;;  %v2356_v52 = vpack.c.bf16 %v862_v21, %v861_v20  ;;  %v1016_v12 = vld [vmem:[%s3337_s2 + $0xa8] sm:$0xff] }
 0x135   : > { %v741_v54 = vadd.f32 %v2106_v24, %v656_v13  ;;  %2333 = vmatprep.subr.bf16.mxu0 %v2332_v26  ;;  %v836_v55 = vmul.f32 %v1898_v56, %v821_v22  ;;  %v845_v58 = vmul.f32 %v1899_v57, %v821_v22  ;;  %v854_v59 = vmul.f32 %v1900_v0, %v821_v22  ;;  %v996_v13 = vld [vmem:[%s3337_s2 + $0x8] sm:$0xff] }
 0x136   : > { %2335 = vmatpush3.bf16.msra.mxu0 %v2332_v26  ;;  %v863_v61 = vmul.f32 %v1901_v60, %v821_v22  ;;  %v1921_v16 = vcombine.high %v1012_v11, %v1016_v12  ;;  %v1020_v19 = vld [vmem:[%s3337_s2 + $0xc8] sm:$0xff]  ;;  %v1920_v21 = vcombine.low %v1012_v11, %v1016_v12  ;;  %v1005_v11 = vld [vmem:[%s3337_s2 + $0x50] sm:$0xff] }
 0x137   : > { %v826_v6 = vadd.f32 %v2150_v50, %v741_v54  ;;  %v1024_v20 = vld [vmem:[%s3337_s2 + $0xe8] sm:$0xff]  ;;  %v1009_v12 = vld [vmem:[%s3337_s2 + $0x70] sm:$0xff] }
 0x138   : > { %v1929_v22 = vcombine.high %v1020_v19, %v1024_v20  ;;  %v1028_v24 = vld [vmem:[%s3337_s2 + $0x108] sm:$0xff]  ;;  %v1928_v26 = vcombine.low %v1020_v19, %v1024_v20 }
 0x139   : > { %v837_v63 = vmul.f32 %v1898_v56, %v826_v6  ;;  %v846_v44 = vmul.f32 %v1899_v57, %v826_v6  ;;  %v855_v46 = vmul.f32 %v1900_v0, %v826_v6  ;;  %v864_v53 = vmul.f32 %v1901_v60, %v826_v6  ;;  %v1004_v57 = vld [vmem:[%s3337_s2 + $0x48] sm:$0xff] }
 0x13a   : > { %v1008_v0 = vld [vmem:[%s3337_s2 + $0x68] sm:$0xff] }
 0x13b   : > { %v2336_v3 = vpack.c.bf16 %v837_v63, %v836_v55  ;;  %v2344_v8 = vpack.c.bf16 %v846_v44, %v845_v58  ;;  %v2352_v9 = vpack.c.bf16 %v855_v46, %v854_v59  ;;  %v2360_v4 = vpack.c.bf16 %v864_v53, %v863_v61  ;;  %v1000_v44 = vld [vmem:[%s3337_s2 + $0x28] sm:$0xff] }
 0x13c   : > { %v1905_v56 = vcombine.high %v996_v13, %v1000_v44  ;;  %v866_v60 = vld [vmem:[%s3338_s3 + $0x8] sm:$0xff]  ;;  %v1904_v5 = vcombine.low %v996_v13, %v1000_v44  ;;  %v1913_v10 = vcombine.high %v1004_v57, %v1008_v0  ;;  %v1912_v15 = vcombine.low %v1004_v57, %v1008_v0 }
 0x13d   : > { %2337 = vmatprep.subr.bf16.mxu0 %v2336_v3  ;;  %v1032_v25 = vld [vmem:[%s3337_s2 + $0x128] sm:$0xff]  ;;  %v2432_v57 = vmov 0  }
 0x13e   : > { %2339 = vmatpush3.bf16.msra.mxu0 %v2336_v3  ;;  %v1036_v50 = vld [vmem:[%s3337_s2 + $0x148] sm:$0xff]  ;;  %1411 = vmatprep.mubr.bf16.mxu1 %v2432_v57 }
 0x13f   : > { %2341 = vmatprep.subr.bf16.mxu0 %v2340_v45  ;;  %v1044_v6 = vld [vmem:[%s3337_s2 + $0x188] sm:$0xff]  ;;  %2405 = vset.pattern.permute.xlu0 %v2432_v57 }
 0x140   : > { %v1048_v55 = vld [vmem:[%s3337_s2 + $0x1a8] sm:$0xff] }
 0x141   : > { %v1953_v59 = vcombine.high %v1044_v6, %v1048_v55  ;;  %v1052_v61 = vld [vmem:[%s3337_s2 + $0x1c8] sm:$0xff]  ;;  %v1952_v46 = vcombine.low %v1044_v6, %v1048_v55  ;;  %v1021_v55 = vld [vmem:[%s3337_s2 + $0xd0] sm:$0xff] }
 0x142   : > { %2343 = vmatpush3.bf16.msra.mxu0 %v2340_v45  ;;  %v1937_v45 = vcombine.high %v1028_v24, %v1032_v25  ;;  %v1056_v63 = vld [vmem:[%s3337_s2 + $0x1e8] sm:$0xff] }
 0x143   : > { %2345 = vmatprep.subr.bf16.mxu0 %v2344_v8  ;;  %v1961_v53 = vcombine.high %v1052_v61, %v1056_v63  ;;  %v1960_v3 = vcombine.low %v1052_v61, %v1056_v63  ;;  %v1026_v61 = vld [vmem:[%s3337_s2 + $0xf8] sm:$0xff] }
 0x146   : > { %2347 = vmatpush3.bf16.msra.mxu0 %v2344_v8  ;;  %v997_v8 = vld [vmem:[%s3337_s2 + $0x10] sm:$0xff] }
 0x147   : > { %2349 = vmatprep.subr.bf16.mxu0 %v2348_v51 }
 0x14a   : > { %2351 = vmatpush3.bf16.msra.mxu0 %v2348_v51  ;;  %v1040_v51 = vld [vmem:[%s3337_s2 + $0x168] sm:$0xff] }
 0x14b   : > { %2353 = vmatprep.subr.bf16.mxu0 %v2352_v9  ;;  %v1945_v54 = vcombine.high %v1036_v50, %v1040_v51  ;;  %v1944_v58 = vcombine.low %v1036_v50, %v1040_v51  ;;  %v1018_v50 = vld [vmem:[%s3337_s2 + $0xb8] sm:$0xff]  ;;  %v1914_v51 = vcombine.low %v1005_v11, %v1009_v12 }
 0x14e   : > { %2355 = vmatpush3.bf16.msra.mxu0 %v2352_v9  ;;  %v1001_v9 = vld [vmem:[%s3337_s2 + $0x30] sm:$0xff] }
 0x14f   : > { %2357 = vmatprep.subr.bf16.mxu0 %v2356_v52  ;;  %v1906_v13 = vcombine.low %v997_v8, %v1001_v9  ;;  %v1907_v44 = vcombine.high %v997_v8, %v1001_v9  ;;  %v1029_v8 = vld [vmem:[%s3337_s2 + $0x110] sm:$0xff] }
 0x150   : > { %v1033_v9 = vld [vmem:[%s3337_s2 + $0x130] sm:$0xff] }
 0x151   : > { %1465 = vmatprep.subr.bf16.mxu1 %v1907_v44 }
 0x152   : > { %2359 = vmatpush3.bf16.msra.mxu0 %v2356_v52  ;;  %v1936_v52 = vcombine.low %v1028_v24, %v1032_v25  ;;  %v1013_v25 = vld [vmem:[%s3337_s2 + $0x90] sm:$0xff] }
 0x153   : > { %2361 = vmatprep.subr.bf16.mxu0 %v2360_v4 }
 0x156   : > { %2363 = vmatpush3.bf16.msra.mxu0 %v2360_v4  ;;  %v998_v4 = vld [vmem:[%s3337_s2 + $0x18] sm:$0xff] }
 0x157   : > { %1422 = vmatprep.subr.bf16.mxu0 %v1905_v56  ;;  %v1002_v56 = vld [vmem:[%s3337_s2 + $0x38] sm:$0xff] }
 0x158   : > { %v1908_v0 = vcombine.low %v998_v4, %v1002_v56 }
 0x159   : > { %2202 = vmatmul.mubr.f32.vlgmr.msra.gmra.mrb[16].mxu0 %v866_v60  ;;  %v1909_v60 = vcombine.high %v998_v4, %v1002_v56  ;;  %v1030_v4 = vld [vmem:[%s3337_s2 + $0x118] sm:$0xff] }
 0x15a   : > { %1423 = vmatpush1.bf16.msra.mxu0 %v1904_v5  ;;  %1454 = vmatprep.mubr.bf16.mxu0 %v2432_v57  ;;  %v1732_v5 = vld [vmem:[%s3341_s6] sm:$0xff] }
 0x15b   : > { %1424 = vmatprep.subr.bf16.mxu0 %v1913_v10  ;;  %1736 = vperm.xlu0 %2405, %v1732_v5   ;;  %v1733_v10 = vld [vmem:[%s3341_s6 + $0x8] sm:$0xff]  ;;  %v1037_v5 = vld [vmem:[%s3337_s2 + $0x150] sm:$0xff] }
 0x15e   : > { %1425 = vmatpush1.bf16.msra.mxu0 %v1912_v15  ;;  %v1006_v15 = vld [vmem:[%s3337_s2 + $0x58] sm:$0xff] }
 0x15f   : > { %1426 = vmatprep.subr.bf16.mxu0 %v1921_v16  ;;  %1741 = vperm.xlu0 %2405, %v1733_v10   ;;  %v1010_v16 = vld [vmem:[%s3337_s2 + $0x78] sm:$0xff]  ;;  %v1041_v10 = vld [vmem:[%s3337_s2 + $0x170] sm:$0xff] }
 0x160   : > { %v1917_v24 = vcombine.high %v1006_v15, %v1010_v16 }
 0x162   : > { %1427 = vmatpush1.bf16.msra.mxu0 %v1920_v21 }
 0x163   : > { %1428 = vmatprep.subr.bf16.mxu0 %v1929_v22  ;;  %v1915_v22 = vcombine.high %v1005_v11, %v1009_v12  ;;  %v1038_v11 = vld [vmem:[%s3337_s2 + $0x158] sm:$0xff] }
 0x164   : > { %v1042_v12 = vld [vmem:[%s3337_s2 + $0x178] sm:$0xff] }
 0x166   : > { %1429 = vmatpush1.bf16.msra.mxu0 %v1928_v26  ;;  %v1017_v26 = vld [vmem:[%s3337_s2 + $0xb0] sm:$0xff] }
 0x167   : > { %1430 = vmatprep.subr.bf16.mxu0 %v1937_v45  ;;  %v1014_v45 = vld [vmem:[%s3337_s2 + $0x98] sm:$0xff]  ;;  %v1922_v63 = vcombine.low %v1013_v25, %v1017_v26 }
 0x168   : > { %v1925_v6 = vcombine.high %v1014_v45, %v1018_v50 }
 0x16a   : > { %1431 = vmatpush1.bf16.msra.mxu0 %v1936_v52  ;;  %v1916_v52 = vcombine.low %v1006_v15, %v1010_v16  ;;  %v1938_v15 = vcombine.low %v1029_v8, %v1033_v9 }
 0x16b   : > { %1432 = vmatprep.subr.bf16.mxu0 %v1945_v54  ;;  %v1923_v54 = vcombine.high %v1013_v25, %v1017_v26  ;;  %v1046_v25 = vld [vmem:[%s3337_s2 + $0x198] sm:$0xff] }
 0x16c   : > { %v1050_v26 = vld [vmem:[%s3337_s2 + $0x1b8] sm:$0xff] }
 0x16e   : > { %1433 = vmatpush1.bf16.msra.mxu0 %v1944_v58  ;;  %v1025_v58 = vld [vmem:[%s3337_s2 + $0xf0] sm:$0xff] }
 0x16f   : > { %1434 = vmatprep.subr.bf16.mxu0 %v1953_v59  ;;  %v1022_v59 = vld [vmem:[%s3337_s2 + $0xd8] sm:$0xff]  ;;  %v1930_v44 = vcombine.low %v1021_v55, %v1025_v58 }
 0x170   : > { %v1932_v56 = vcombine.low %v1022_v59, %v1026_v61 }
 0x172   : > { %1435 = vmatpush1.bf16.msra.mxu0 %v1952_v46  ;;  %v1924_v46 = vcombine.low %v1014_v45, %v1018_v50  ;;  %v1946_v45 = vcombine.low %v1037_v5, %v1041_v10  ;;  %v1948_v50 = vcombine.low %v1038_v11, %v1042_v12 }
 0x173   : > { %1436 = vmatprep.subr.bf16.mxu0 %v1961_v53  ;;  %v1931_v53 = vcombine.high %v1021_v55, %v1025_v58  ;;  %v1054_v55 = vld [vmem:[%s3337_s2 + $0x1d8] sm:$0xff] }
 0x174   : > { %v1058_v58 = vld [vmem:[%s3337_s2 + $0x1f8] sm:$0xff] }
 0x176   : > { %1437 = vmatpush1.bf16.msra.mxu0 %v1960_v3  ;;  %v1933_v3 = vcombine.high %v1022_v59, %v1026_v61  ;;  %v1956_v61 = vcombine.low %v1046_v25, %v1050_v26 }
 0x177   : > { %1508 = vmatprep.subr.bf16.mxu0 %v1909_v60 }
 0x22c   : > { %v2203_v19 = vpop.f32.mrb[16].mxu0 }
 0x22d   : > { %v933_v20 = vpop.f32.mrb[17].mxu0 }
 0x22e   : > { %v3155_v21 = vpack.c.bf16 %v2203_v19, %v933_v20  ;;  %v1947_v19 = vcombine.high %v1037_v5, %v1041_v10  ;;  %v1949_v20 = vcombine.high %v1038_v11, %v1042_v12 }
 0x230   : > { %1412 = vmatmul.mubr.bf16.vlgmr.msra.gmra.mrb[16].mxu1 %v3155_v21  ;;  %1455 = vmatmul.mubr.bf16.vlgmr.msra.gmra.mrb[20].mxu0 %v3155_v21 }
 0x231   : > { %1466 = vmatpush1.bf16.msra.mxu1 %v1906_v13  ;;  %1509 = vmatpush1.bf16.msra.mxu0 %v1908_v0  ;;  %v1034_v13 = vld [vmem:[%s3337_s2 + $0x138] sm:$0xff]  ;;  %v1939_v0 = vcombine.high %v1029_v8, %v1033_v9  ;;  %v2407_v8 = vld [vmem:[%s2653_s13 + $0x8] sm:$0xff] }
 0x232   : > { %1467 = vmatprep.subr.bf16.mxu1 %v1915_v22  ;;  %1510 = vmatprep.subr.bf16.mxu0 %v1917_v24  ;;  %v1941_v60 = vcombine.high %v1030_v4, %v1034_v13  ;;  %v1940_v16 = vcombine.low %v1030_v4, %v1034_v13  ;;  %v1045_v22 = vld [vmem:[%s3337_s2 + $0x190] sm:$0xff]  ;;  %v979_v9 = vpack.c.bf16 %v2765_v62, %v2407_v8 }
 0x233   : > { %1497 = vmatprep.mubr.bf16.mxu1 %v2432_v57  ;;  %1540 = vmatprep.mubr.bf16.mxu0 %v2432_v57  ;;  %v1049_v24 = vld [vmem:[%s3337_s2 + $0x1b0] sm:$0xff]  ;;  %v978_v4 = vpack.c.bf16 %v2774_v2, %v2736_v48  ;;  %v987_v13 = vpack.c.bf16 %v2844_v30, %v2804_v14  ;;  %v2406_v48 = vld [vmem:[%s3340_s5] sm:$0xff]   ;;  %v989_v14 = vpack.c.bf16 %v2851_v33, %v2811_v17 }
 0x234   : > { %v1954_v59 = vcombine.low %v1045_v22, %v1049_v24  ;;  %v991_v17 = vpack.c.bf16 %v2991_v41, %v2975_v36  ;;  %v985_v30 = vpack.c.bf16 %v2962_v31, %v2888_v49  ;;  %v984_v33 = vpack.c.bf16 %v2972_v35, %v2956_v28  ;;  %v3280_v36 = vpop.permute.xlu0 %1736 }
 0x235   : > { %1468 = vmatpush1.bf16.msra.mxu1 %v1914_v51  ;;  %1511 = vmatpush1.bf16.msra.mxu0 %v1916_v52  ;;  %v1955_v51 = vcombine.high %v1045_v22, %v1049_v24  ;;  %v1957_v52 = vcombine.high %v1046_v25, %v1050_v26 }
 0x236   : > { %1469 = vmatprep.subr.bf16.mxu1 %v1923_v54  ;;  %1512 = vmatprep.subr.bf16.mxu0 %v1925_v6  ;;  %v1053_v54 = vld [vmem:[%s3337_s2 + $0x1d0] sm:$0xff] }
 0x237   : > { %v1057_v6 = vld [vmem:[%s3337_s2 + $0x1f0] sm:$0xff] }
 0x239   : > { %1470 = vmatpush1.bf16.msra.mxu1 %v1922_v63  ;;  %1513 = vmatpush1.bf16.msra.mxu0 %v1924_v46  ;;  %v1963_v63 = vcombine.high %v1053_v54, %v1057_v6  ;;  %v1965_v46 = vcombine.high %v1054_v55, %v1058_v58 }
 0x23a   : > { %1471 = vmatprep.subr.bf16.mxu1 %v1931_v53  ;;  %1514 = vmatprep.subr.bf16.mxu0 %v1933_v3  ;;  %v1962_v53 = vcombine.low %v1053_v54, %v1057_v6  ;;  %v1964_v3 = vcombine.low %v1054_v55, %v1058_v58 }
 0x23d   : > { %1472 = vmatpush1.bf16.msra.mxu1 %v1930_v44  ;;  %1515 = vmatpush1.bf16.msra.mxu0 %v1932_v56  ;;  %v947_v44 = vld [vmem:[%s2653_s13 + $0x18] sm:$0xff]  ;;  %v986_v56 = vpack.c.bf16 %v2854_v34, %v2814_v18  ;;  %v988_v18 = vpack.c.bf16 %v2863_v39, %v2823_v23  ;;  %v990_v23 = vpack.c.bf16 %v3000_v43, %v2984_v38  ;;  %v3345_v39 = vld [vmem:[#allocation3_spill] sm:$0xff] }
 0x23e   : > { %1473 = vmatprep.subr.bf16.mxu1 %v1939_v0  ;;  %1516 = vmatprep.subr.bf16.mxu0 %v1941_v60  ;;  %v981_v62 = vpack.c.bf16 %v2771_v1, %v947_v44  ;;  %v946_v0 = vld [vmem:[%s2653_s13 + $0x10] sm:$0xff]  ;;  %v983_v1 = vpack.c.bf16 %v2959_v29, %v2885_v47  ;;  %v993_v34 = vpack.c.bf16 %v2994_v42, %v2978_v37  ;;  %s1974_s13 = sshll.u32 %s3351_s24, 7 }
 0x23f   : > { %v980_v2 = vpack.c.bf16 %v2783_v7, %v946_v0  ;;  %v982_v7 = vpack.c.bf16 %v2968_v32, %v2953_v27  ;;  %v992_v47 = vpack.c.bf16 %v3345_v39, %v2988_v40  ;;  %v3285_v40 = vpop.permute.xlu0 %1741  ;;  %s3291_s11 = scalar_lea.vmem %s3342_s7, %s1974_s13 }
 0x241   : > { %1474 = vmatpush1.bf16.msra.mxu1 %v1938_v15  ;;  %1517 = vmatpush1.bf16.msra.mxu0 %v1940_v16 }
 0x242   : > { %1475 = vmatprep.subr.bf16.mxu1 %v1947_v19  ;;  %1518 = vmatprep.subr.bf16.mxu0 %v1949_v20 }
 0x245   : > { %1476 = vmatpush1.bf16.msra.mxu1 %v1946_v45  ;;  %1519 = vmatpush1.bf16.msra.mxu0 %v1948_v50 }
 0x246   : > { %1477 = vmatprep.subr.bf16.mxu1 %v1955_v51  ;;  %1520 = vmatprep.subr.bf16.mxu0 %v1957_v52 }
 0x249   : > { %1478 = vmatpush1.bf16.msra.mxu1 %v1954_v59  ;;  %1521 = vmatpush1.bf16.msra.mxu0 %v1956_v61 }
 0x24a   : > { %1479 = vmatprep.subr.bf16.mxu1 %v1963_v63  ;;  %1522 = vmatprep.subr.bf16.mxu0 %v1965_v46 }
 0x24d   : > { %1480 = vmatpush1.bf16.msra.mxu1 %v1962_v53  ;;  %1523 = vmatpush1.bf16.msra.mxu0 %v1964_v3 }
 0x24e   : > { %1560 = vmatprep.subr.bf16.mxu1 %v979_v9 }
 0x250   : > { %1498 = vmatmul.mubr.bf16.vlgmr.msra.gmra.mrb[20].mxu1 %v3155_v21  ;;  %1541 = vmatmul.mubr.bf16.vlgmr.msra.gmra.mrb[24].mxu0 %v3155_v21 }
 0x251   : > { %1561 = vmatpush1.bf16.msra.mxu1 %v978_v4  ;;  %1592 = vmatprep.mubr.bf16.mxu1 %v2432_v57 }
 0x252   : > { %1562 = vmatprep.subr.bf16.mxu1 %v987_v13 }
 0x255   : > { %1563 = vmatpush1.bf16.msra.mxu1 %v986_v56 }
 0x256   : > { %1603 = vmatprep.subr.bf16.mxu1 %v981_v62 }
 0x258   : > { %1967 = vmatmul.mubr.msk.bf16.vlgmr.msra.gmra.mrb[16].mxu1 %vm1556_vm0, %v2406_v48 }
 0x259   : > { %1604 = vmatpush1.bf16.msra.mxu1 %v980_v2  ;;  %1635 = vmatprep.mubr.bf16.mxu1 %v2432_v57 }
 0x25a   : > { %1605 = vmatprep.subr.bf16.mxu1 %v989_v14 }
 0x25d   : > { %1606 = vmatpush1.bf16.msra.mxu1 %v988_v18 }
 0x25e   : > { %1646 = vmatprep.subr.bf16.mxu1 %v983_v1 }
 0x260   : > { %1968 = vmatmul.mubr.msk.bf16.vlgmr.msra.gmra.mrb[24].mxu1 %vm1556_vm0, %v2406_v48 }
 0x261   : > { %1647 = vmatpush1.bf16.msra.mxu1 %v982_v7  ;;  %1678 = vmatprep.mubr.bf16.mxu1 %v2432_v57 }
 0x262   : > { %1648 = vmatprep.subr.bf16.mxu1 %v991_v17 }
 0x265   : > { %1649 = vmatpush1.bf16.msra.mxu1 %v990_v23 }
 0x266   : > { %1689 = vmatprep.subr.bf16.mxu1 %v985_v30 }
 0x268   : > { %1969 = vmatmul.mubr.msk.bf16.vlgmr.msra.gmra.mrb[20].mxu1 %vm1556_vm0, %v2406_v48 }
 0x269   : > { %1690 = vmatpush1.bf16.msra.mxu1 %v984_v33  ;;  %1721 = vmatprep.mubr.bf16.mxu1 %v2432_v57 }
 0x26a   : > { %1691 = vmatprep.subr.bf16.mxu1 %v993_v34 }
 0x26d   : > { %1692 = vmatpush1.bf16.msra.mxu1 %v992_v47 }
 0x270   : > { %1970 = vmatmul.mubr.msk.bf16.vlgmr.msra.gmra.mrb[28].mxu1 %vm1556_vm0, %v2406_v48 }
 0x303   : > { %v1456_v49 = vpop.f32.mrb[20].mxu0 }
 0x304   : > { %v1458_v27 = vpop.f32.mrb[21].mxu0 }
 0x305   : > { %v1460_v28 = vpop.f32.mrb[22].mxu0 }
 0x306   : > { %v1462_v29 = vpop.f32.mrb[23].mxu0 }
 0x323   : > { %v1542_v31 = vpop.f32.mrb[24].mxu0 }
 0x324   : > { %v1544_v32 = vpop.f32.mrb[25].mxu0 }
 0x325   : > { %v3278_v35 = vpop.f32.mrb[26].mxu0 }
 0x326   : > { %v3282_v37 = vpop.f32.mrb[27].mxu0 }
 0x32b   : > { %v1594_v38 = vpop.f32.mrb[16].mxu1 }
 0x32c   : > { %v1744_v41 = vadd.f32 %v3280_v36, %v1594_v38  ;;  %v1596_v42 = vpop.f32.mrb[17].mxu1 }
 0x32d   : > { %v1745_v43 = vadd.f32 %v3280_v36, %v1596_v42  ;;  %v1598_v57 = vpop.f32.mrb[18].mxu1 }
 0x32e   : > { %v1760_v21 = vmax.f32 %v1744_v41, 0.0  ;;  %v1752_v60 = vadd.f32 %v3285_v40, %v1598_v57  ;;  %v1600_v5 = vpop.f32.mrb[19].mxu1 }
 0x32f   : > { %v1761_v10 = vmax.f32 %v1745_v43, 0.0  ;;  %v1753_v11 = vadd.f32 %v3285_v40, %v1600_v5 }
 0x330   : > { %1776 = vst [vmem:[%s3291_s11] sm:$0xff] %v1760_v21  ;;  %v1768_v12 = vmax.f32 %v1752_v60, 0.0 }
 0x331   : > { %1777 = vst [vmem:[%s3291_s11 + $0x8] sm:$0xff] %v1761_v10  ;;  %v1769_v15 = vmax.f32 %v1753_v11, 0.0 }
 0x332   : > { %1784 = vst [vmem:[%s3291_s11 + $0x40] sm:$0xff] %v1768_v12 }
 0x333   : > { %1785 = vst [vmem:[%s3291_s11 + $0x48] sm:$0xff] %v1769_v15  ;;  %v1637_v16 = vpop.f32.mrb[24].mxu1 }
 0x334   : > { %v1638_v19 = vadd.f32 %v1637_v16, %v1456_v49  ;;  %v1639_v20 = vpop.f32.mrb[25].mxu1 }
 0x335   : > { %v1640_v22 = vadd.f32 %v1639_v20, %v1458_v27  ;;  %v1641_v24 = vpop.f32.mrb[26].mxu1 }
 0x336   : > { %v1746_v25 = vadd.f32 %v3280_v36, %v1638_v19  ;;  %v1642_v26 = vadd.f32 %v1641_v24, %v1460_v28  ;;  %v1643_v45 = vpop.f32.mrb[27].mxu1 }
 0x337   : > { %v1747_v50 = vadd.f32 %v3280_v36, %v1640_v22  ;;  %v1644_v51 = vadd.f32 %v1643_v45, %v1462_v29 }
 0x338   : > { %v1762_v52 = vmax.f32 %v1746_v25, 0.0  ;;  %v1754_v54 = vadd.f32 %v3285_v40, %v1642_v26 }
 0x339   : > { %v1763_v6 = vmax.f32 %v1747_v50, 0.0  ;;  %v1755_v55 = vadd.f32 %v3285_v40, %v1644_v51 }
 0x33a   : > { %1778 = vst [vmem:[%s3291_s11 + $0x10] sm:$0xff] %v1762_v52  ;;  %v1770_v58 = vmax.f32 %v1754_v54, 0.0 }
 0x33b   : > { %1779 = vst [vmem:[%s3291_s11 + $0x18] sm:$0xff] %v1763_v6  ;;  %v1771_v59 = vmax.f32 %v1755_v55, 0.0  ;;  %v1680_v61 = vpop.f32.mrb[20].mxu1 }
 0x33c   : > { %1786 = vst [vmem:[%s3291_s11 + $0x50] sm:$0xff] %v1770_v58  ;;  %v1748_v63 = vadd.f32 %v3280_v36, %v1680_v61  ;;  %v1682_v46 = vpop.f32.mrb[21].mxu1 }
 0x33d   : > { %1787 = vst [vmem:[%s3291_s11 + $0x58] sm:$0xff] %v1771_v59  ;;  %v1749_v53 = vadd.f32 %v3280_v36, %v1682_v46  ;;  %v1684_v3 = vpop.f32.mrb[22].mxu1 }
 0x33e   : > { %v1764_v8 = vmax.f32 %v1748_v63, 0.0  ;;  %v1756_v9 = vadd.f32 %v3285_v40, %v1684_v3  ;;  %v1686_v4 = vpop.f32.mrb[23].mxu1 }
 0x33f   : > { %v1765_v13 = vmax.f32 %v1749_v53, 0.0  ;;  %v1757_v44 = vadd.f32 %v3285_v40, %v1686_v4 }
 0x340   : > { %1780 = vst [vmem:[%s3291_s11 + $0x20] sm:$0xff] %v1764_v8  ;;  %v1772_v56 = vmax.f32 %v1756_v9, 0.0 }
 0x341   : > { %1781 = vst [vmem:[%s3291_s11 + $0x28] sm:$0xff] %v1765_v13  ;;  %v1773_v62 = vmax.f32 %v1757_v44, 0.0 }
 0x342   : > { %1788 = vst [vmem:[%s3291_s11 + $0x60] sm:$0xff] %v1772_v56 }
 0x343   : > { %1789 = vst [vmem:[%s3291_s11 + $0x68] sm:$0xff] %v1773_v62  ;;  %v1723_v0 = vpop.f32.mrb[28].mxu1 }
 0x344   : > { %v1724_v48 = vadd.f32 %v1723_v0, %v1542_v31  ;;  %v1725_v2 = vpop.f32.mrb[29].mxu1 }
 0x345   : > { %v1726_v14 = vadd.f32 %v1725_v2, %v1544_v32  ;;  %v1727_v18 = vpop.f32.mrb[30].mxu1 }
 0x346   : > { %v1750_v1 = vadd.f32 %v3280_v36, %v1724_v48  ;;  %v1728_v7 = vadd.f32 %v1727_v18, %v3278_v35  ;;  %v1729_v17 = vpop.f32.mrb[31].mxu1 }
 0x347   : > { %v1751_v23 = vadd.f32 %v3280_v36, %v1726_v14  ;;  %v1730_v30 = vadd.f32 %v1729_v17, %v3282_v37 }
 0x348   : > { %v1766_v33 = vmax.f32 %v1750_v1, 0.0  ;;  %v1758_v34 = vadd.f32 %v3285_v40, %v1728_v7 }
 0x349   : > { %v1767_v39 = vmax.f32 %v1751_v23, 0.0  ;;  %v1759_v47 = vadd.f32 %v3285_v40, %v1730_v30 }
 0x34a   : > { %1782 = vst [vmem:[%s3291_s11 + $0x30] sm:$0xff] %v1766_v33  ;;  %v1774_v49 = vmax.f32 %v1758_v34, 0.0 }
 0x34b   : > { %1783 = vst [vmem:[%s3291_s11 + $0x38] sm:$0xff] %v1767_v39  ;;  %v1775_v27 = vmax.f32 %v1759_v47, 0.0 }
 0x34c   : > { %1790 = vst [vmem:[%s3291_s11 + $0x70] sm:$0xff] %v1774_v49 }
 0x34d   : > { %1791 = vst [vmem:[%s3291_s11 + $0x78] sm:$0xff] %v1775_v27 }
 0x34e PF: > { %s17_s26 = sadd.s32 1, %s2430_s26   ;;  %s3346_s24 = smov %s2426_s25 }
 0x34f   : > { %p14_p5 = scmp.ge.s32.totalorder %s17_s26, 4   ;;  %s3347_s25 = smov %s3349_s27 }
 0x351   :  { %16 = sbr.rel (!%p14_p5) target bundleno = 2 (0x2), region = 85 }

</bundles_post_ra>
